<compile_context>
chip_gen: v6e
topology: v6e:2x2x1
jax: 0.10.0
libtpu: 0.0.40
codegen_flags: <defaults>
</compile_context>

<pallas_src>
import jax
import jax.numpy as jnp
from jax.experimental import pallas as pl
from jax.experimental.pallas import tpu as pltpu
from functools import partial

# ----- module hyperparameters (NeRFSmall_bg.__init__ defaults) -----
NUM_LAYERS = 3
HIDDEN_DIM = 64
GEO_FEAT_DIM = 15
NUM_LAYERS_COLOR = 2
HIDDEN_DIM_COLOR = 16
INPUT_CH = 3
SIGMA_OUT = 1 + GEO_FEAT_DIM  # 16


def _round_up(a, b):
    return -(-a // b) * b


def nerf_small_bg_kernel(xt_ref, wa_ref, w1_ref, w2_ref, cw0h_ref,
                         cw1_ref, cb1_ref, out_ref):
    """Feature-major tile.

    xt_ref  : [4, TN] f32  — rows 0..2 = x^T, row 3 = ones (for folded cb0).
    wa_ref  : [80, 4] bf16 — rows 0:64 = sigma layer-0 weight (bias col = 0),
                              rows 64:80 = x-part of color layer-0 weight with
                              cb0 in column 3.
    w1_ref  : [64, 64] bf16, w2_ref: [16, 64] bf16 (sigma layers 1, 2).
    cw0h_ref: [16, 16] bf16 — col 0 zeroed (sigma row of h), cols 1:16 = geo.
    cw1_ref : [3, 16] bf16, cb1_ref: [3, 1] f32 (last color layer).
    out_ref : [4, TN] f32  — row 0 = sigma^T, rows 1..3 = color^T.
    """
    xt_bf = xt_ref[...].astype(jnp.bfloat16)                       # [4, TN]

    # ---- merged x projection: sigma layer 0 + color-layer-0 x-term (+cb0) ----
    proj = jnp.dot(wa_ref[...], xt_bf,
                   preferred_element_type=jnp.float32)             # [80, TN]
    h = jnp.maximum(proj[:HIDDEN_DIM, :], 0.0)                     # [64, TN]
    xcol = proj[HIDDEN_DIM:, :]                                    # [16, TN]

    # ---- sigma_net layers 1 and 2 (relu after every layer, incl. last) ----
    h = jnp.dot(w1_ref[...], h.astype(jnp.bfloat16),
                preferred_element_type=jnp.float32)                # [64, TN]
    h = jnp.maximum(h, 0.0)
    h = jnp.dot(w2_ref[...], h.astype(jnp.bfloat16),
                preferred_element_type=jnp.float32)                # [16, TN]
    h = jnp.maximum(h, 0.0)

    # sigma = h[..., :1]  -> row 0 in the transposed layout.
    out_ref[0:1, :] = h[0:1, :]

    # ---- color layer 0: W_geo(padded) @ h + (W_x @ x + cb0), then relu ----
    hc = jnp.dot(cw0h_ref[...], h.astype(jnp.bfloat16),
                 preferred_element_type=jnp.float32) + xcol        # [16, TN]
    hc = jnp.maximum(hc, 0.0)

    # ---- color layer 1 (last): Linear(16 -> 3, bias), then sigmoid ----
    c = (jnp.dot(cw1_ref[...], hc.astype(jnp.bfloat16),
                 preferred_element_type=jnp.float32)
         + cb1_ref[...])                                           # [3, TN]
    out_ref[1:4, :] = jax.nn.sigmoid(c)


def _prepare_kernel_params(params):
    """PyTorch-layout f32 params -> consolidated bf16 kernel slabs."""
    w0, w1, w2, cw0, cb0, cw1, cb1 = params
    # WA [80,4]: rows 0:64 = w0 with a zero bias column,
    #            rows 64:80 = cw0's x-columns with cb0 as the 4th column.
    top = jnp.concatenate([w0, jnp.zeros((HIDDEN_DIM, 1), w0.dtype)], axis=1)
    bot = jnp.concatenate([cw0[:, GEO_FEAT_DIM:], cb0.reshape(-1, 1)], axis=1)
    wa = jnp.concatenate([top, bot], axis=0).astype(jnp.bfloat16)          # [80, 4]
    # Fold the geo_feat = h[..., 1:] slice into the weight: zero sigma column.
    cw0h = jnp.concatenate(
        [jnp.zeros((HIDDEN_DIM_COLOR, 1), cw0.dtype), cw0[:, :GEO_FEAT_DIM]],
        axis=1).astype(jnp.bfloat16)                                       # [16, 16]
    return (wa,
            w1.astype(jnp.bfloat16),
            w2.astype(jnp.bfloat16),
            cw0h,
            cw1.astype(jnp.bfloat16),
            cb1.reshape(3, 1).astype(jnp.float32))


def _pallas_forward_t(xt, kparams, tn_eff):
    """xt: [4, n_pad] with n_pad a multiple of tn_eff. Returns fused [4, n_pad]."""
    wa, w1, w2, cw0h, cw1, cb1 = kparams
    n_pad = xt.shape[1]
    grid = (n_pad // tn_eff,)

    def wspec(shape):
        return pl.BlockSpec(shape, lambda i: (0, 0))

    return pl.pallas_call(
        nerf_small_bg_kernel,
        out_shape=jax.ShapeDtypeStruct((4, n_pad), jnp.float32),
        grid_spec=pl.GridSpec(
            grid=grid,
            in_specs=[
                pl.BlockSpec((4, tn_eff), lambda i: (0, i)),   # x^T tile (lane-dense)
                wspec(wa.shape), wspec(w1.shape), wspec(w2.shape),
                wspec(cw0h.shape), wspec(cw1.shape), wspec(cb1.shape),
            ],
            out_specs=pl.BlockSpec((4, tn_eff), lambda i: (0, i)),  # fused output
        ),
        compiler_params=pltpu.CompilerParams(
            dimension_semantics=("parallel",),        # shard tiles across TCs (v7x)
            vmem_limit_bytes=32 * 1024 * 1024),       # safe on v5e/v6e/v7x
    )(xt, wa, w1, w2, cw0h, cw1, cb1)


@partial(jax.jit, static_argnames=("tn",))
def nerf_small_bg_forward(x, params, tn=8192):
    """x: [N, INPUT_CH] float32 (any N). Returns (sigma [N, 1], color [N, 3]).

    params are in PyTorch nn.Linear layout:
      (w0[64,3], w1[64,64], w2[16,64], cw0[16,18], cb0[16], cw1[3,16], cb1[3]).
    `tn` is the maximum points per grid step (multiple of 128 recommended).
    """
    N = x.shape[0]
    kparams = _prepare_kernel_params(params)

    # --- grid / tile sizing: even number of steps (>=2) for dual-TC v7x,
    #     per-step tile as close to tn as possible, multiple of 128. ---
    n128 = _round_up(max(N, 1), 128)
    steps = max(2, 2 * (-(-n128 // (2 * tn))))
    tn_eff = _round_up(-(-n128 // steps), 128)
    n_pad = steps * tn_eff

    # Feature-major layout + ones row (folds cb0 into the merged weight).
    x_aug = jnp.concatenate([x, jnp.ones((N, 1), x.dtype)], axis=-1)   # [N, 4]
    xt = x_aug.T                                                        # [4, N]
    if n_pad != N:
        xt = jnp.pad(xt, ((0, 0), (0, n_pad - N)))
    # TODO(synk): for a fully layout-free path, expose a feature-major [4, N]
    # interface to callers and skip the transpose/pad/slice HBM passes.

    fused = _pallas_forward_t(xt, kparams, tn_eff)                      # [4, n_pad]

    # Back to the PyTorch row-major interface.
    sigma = fused[0:1, :N].T                                            # [N, 1]
    color = fused[1:4, :N].T                                            # [N, 3]
    return sigma, color


def init_params(key):
    """Deterministic synthetic params in PyTorch nn.Linear layout ([out, in])."""
    ks = jax.random.split(key, 7)

    def u(k, shape, fan_in):
        bound = 1.0 / (fan_in ** 0.5)
        return jax.random.uniform(k, shape, jnp.float32, -bound, bound)

    # sigma_net (no bias): 3->64, 64->64, 64->16
    w0 = u(ks[0], (HIDDEN_DIM, INPUT_CH), INPUT_CH)
    w1 = u(ks[1], (HIDDEN_DIM, HIDDEN_DIM), HIDDEN_DIM)
    w2 = u(ks[2], (SIGMA_OUT, HIDDEN_DIM), HIDDEN_DIM)

    # color_net: (15+3)->16 with bias, 16->3 with bias
    cin0 = GEO_FEAT_DIM + INPUT_CH
    cw0 = u(ks[3], (HIDDEN_DIM_COLOR, cin0), cin0)
    cb0 = u(ks[4], (HIDDEN_DIM_COLOR,), cin0)
    cw1 = u(ks[5], (3, HIDDEN_DIM_COLOR), HIDDEN_DIM_COLOR)
    cb1 = u(ks[6], (3,), HIDDEN_DIM_COLOR)
    return (w0, w1, w2, cw0, cb0, cw1, cb1)


def reference_forward(x, params):
    """Pure-JAX f32 reference mirroring the PyTorch forward exactly."""
    w0, w1, w2, cw0, cb0, cw1, cb1 = params
    h = jnp.maximum(x @ w0.T, 0.0)
    h = jnp.maximum(h @ w1.T, 0.0)
    h = jnp.maximum(h @ w2.T, 0.0)     # relu applied after the last layer too
    sigma = h[:, :1]
    geo = h[:, 1:]
    hc = jnp.concatenate([geo, x], axis=-1)
    hc = jnp.maximum(hc @ cw0.T + cb0, 0.0)
    color = jax.nn.sigmoid(hc @ cw1.T + cb1)
    return sigma, color


if __name__ == "__main__":
    key = jax.random.PRNGKey(0)
    kx, kp = jax.random.split(key)

    # Small demo: N deliberately NOT a multiple of 128 to exercise the padding
    # path; the grid-sizing logic yields 2 tiles of 1536 points each.
    N = 3000
    x = jax.random.normal(kx, (N, INPUT_CH), jnp.float32)
    params = init_params(kp)

    sigma, color = nerf_small_bg_forward(x, params)
    jax.block_until_ready((sigma, color))

    sigma_ref, color_ref = reference_forward(x, params)
    assert sigma.shape == (N, 1) and color.shape == (N, 3)
    # bf16 MXU inputs (f32 accumulate) -> slightly looser tolerance vs f32 ref.
    assert jnp.allclose(sigma, sigma_ref, atol=5e-2, rtol=5e-2)
    assert jnp.allclose(color, color_ref, atol=5e-2, rtol=5e-2)

    print("KERNEL_OK")
</pallas_src>

<mosaic_0001>
module attributes {stable_mosaic.version = 11 : i64} {
  func.func @nerf_small_bg_kernel(%arg0: i32, %arg1: memref<4x1536xf32, #tpu.memory_space<vmem>>, %arg2: memref<80x4xbf16, #tpu.memory_space<vmem>>, %arg3: memref<64x64xbf16, #tpu.memory_space<vmem>>, %arg4: memref<16x64xbf16, #tpu.memory_space<vmem>>, %arg5: memref<16x16xbf16, #tpu.memory_space<vmem>>, %arg6: memref<3x16xbf16, #tpu.memory_space<vmem>>, %arg7: memref<3x1xf32, #tpu.memory_space<vmem>>, %arg8: memref<4x1536xf32, #tpu.memory_space<vmem>>) attributes {dimension_semantics = [#tpu.dimension_semantics<parallel>], iteration_bounds = array<i64: 2>, scalar_prefetch = 0 : i64, scratch_operands = 0 : i64, tpu.core_type = #tpu.core_type<tc>, window_params = [{transform_indices = @transform_0, window_bounds = array<i64: 4, 1536>}, {pipeline_mode = #tpu.pipeline_mode<synchronous>, transform_indices = @transform_1, window_bounds = array<i64: 80, 4>}, {pipeline_mode = #tpu.pipeline_mode<synchronous>, transform_indices = @transform_2, window_bounds = array<i64: 64, 64>}, {pipeline_mode = #tpu.pipeline_mode<synchronous>, transform_indices = @transform_3, window_bounds = array<i64: 16, 64>}, {pipeline_mode = #tpu.pipeline_mode<synchronous>, transform_indices = @transform_4, window_bounds = array<i64: 16, 16>}, {pipeline_mode = #tpu.pipeline_mode<synchronous>, transform_indices = @transform_5, window_bounds = array<i64: 3, 16>}, {pipeline_mode = #tpu.pipeline_mode<synchronous>, transform_indices = @transform_6, window_bounds = array<i64: 3, 1>}, {transform_indices = @transform_7, window_bounds = array<i64: 4, 1536>}]} {
    %c0 = arith.constant 0 : index
    %c0_0 = arith.constant 0 : index
    %0 = vector.load %arg1[%c0, %c0_0] : memref<4x1536xf32, #tpu.memory_space<vmem>>, vector<4x1536xf32>
    %1 = arith.truncf %0 : vector<4x1536xf32> to vector<4x1536xbf16>
    %c0_1 = arith.constant 0 : index
    %c0_2 = arith.constant 0 : index
    %2 = vector.load %arg2[%c0_1, %c0_2] : memref<80x4xbf16, #tpu.memory_space<vmem>>, vector<80x4xbf16>
    %cst = arith.constant dense<0.000000e+00> : vector<80x1536xf32>
    %3 = tpu.matmul %2, %1, %cst {dimension_numbers = #tpu.dot_dimension_numbers<[1], [0], [0], [1], [0, 0, 1, 1], [], []>} : vector<80x4xbf16>, vector<4x1536xbf16>, vector<80x1536xf32> -> vector<80x1536xf32>
    %4 = vector.extract_strided_slice %3 {offsets = [0, 0], sizes = [64, 1536], strides = [1, 1]} : vector<80x1536xf32> to vector<64x1536xf32>
    %cst_3 = arith.constant 0.000000e+00 : f32
    %5 = vector.broadcast %cst_3 : f32 to vector<64x1536xf32>
    %6 = arith.maximumf %4, %5 : vector<64x1536xf32>
    %7 = vector.extract_strided_slice %3 {offsets = [64, 0], sizes = [16, 1536], strides = [1, 1]} : vector<80x1536xf32> to vector<16x1536xf32>
    %c0_4 = arith.constant 0 : index
    %c0_5 = arith.constant 0 : index
    %8 = vector.load %arg3[%c0_4, %c0_5] : memref<64x64xbf16, #tpu.memory_space<vmem>>, vector<64x64xbf16>
    %9 = arith.truncf %6 : vector<64x1536xf32> to vector<64x1536xbf16>
    %cst_6 = arith.constant dense<0.000000e+00> : vector<64x1536xf32>
    %10 = tpu.matmul %8, %9, %cst_6 {dimension_numbers = #tpu.dot_dimension_numbers<[1], [0], [0], [1], [0, 0, 1, 1], [], []>} : vector<64x64xbf16>, vector<64x1536xbf16>, vector<64x1536xf32> -> vector<64x1536xf32>
    %cst_7 = arith.constant 0.000000e+00 : f32
    %11 = vector.broadcast %cst_7 : f32 to vector<64x1536xf32>
    %12 = arith.maximumf %10, %11 : vector<64x1536xf32>
    %c0_8 = arith.constant 0 : index
    %c0_9 = arith.constant 0 : index
    %13 = vector.load %arg4[%c0_8, %c0_9] : memref<16x64xbf16, #tpu.memory_space<vmem>>, vector<16x64xbf16>
    %14 = arith.truncf %12 : vector<64x1536xf32> to vector<64x1536xbf16>
    %cst_10 = arith.constant dense<0.000000e+00> : vector<16x1536xf32>
    %15 = tpu.matmul %13, %14, %cst_10 {dimension_numbers = #tpu.dot_dimension_numbers<[1], [0], [0], [1], [0, 0, 1, 1], [], []>} : vector<16x64xbf16>, vector<64x1536xbf16>, vector<16x1536xf32> -> vector<16x1536xf32>
    %cst_11 = arith.constant 0.000000e+00 : f32
    %16 = vector.broadcast %cst_11 : f32 to vector<16x1536xf32>
    %17 = arith.maximumf %15, %16 : vector<16x1536xf32>
    %18 = vector.extract_strided_slice %17 {offsets = [0, 0], sizes = [1, 1536], strides = [1, 1]} : vector<16x1536xf32> to vector<1x1536xf32>
    %c0_12 = arith.constant 0 : index
    %c0_13 = arith.constant 0 : index
    %19 = vector.load %arg8[%c0_12, %c0_13] : memref<4x1536xf32, #tpu.memory_space<vmem>>, vector<1x1536xf32>
    tpu.vector_store %arg8[%c0_12, %c0_13], %18 {strides = array<i32>} : memref<4x1536xf32, #tpu.memory_space<vmem>>, vector<1x1536xf32>,
    %c0_14 = arith.constant 0 : index
    %c0_15 = arith.constant 0 : index
    %20 = vector.load %arg5[%c0_14, %c0_15] : memref<16x16xbf16, #tpu.memory_space<vmem>>, vector<16x16xbf16>
    %21 = arith.truncf %17 : vector<16x1536xf32> to vector<16x1536xbf16>
    %cst_16 = arith.constant dense<0.000000e+00> : vector<16x1536xf32>
    %22 = tpu.matmul %20, %21, %cst_16 {dimension_numbers = #tpu.dot_dimension_numbers<[1], [0], [0], [1], [0, 0, 1, 1], [], []>} : vector<16x16xbf16>, vector<16x1536xbf16>, vector<16x1536xf32> -> vector<16x1536xf32>
    %23 = arith.addf %22, %7 : vector<16x1536xf32>
    %cst_17 = arith.constant 0.000000e+00 : f32
    %24 = vector.broadcast %cst_17 : f32 to vector<16x1536xf32>
    %25 = arith.maximumf %23, %24 : vector<16x1536xf32>
    %c0_18 = arith.constant 0 : index
    %c0_19 = arith.constant 0 : index
    %26 = vector.load %arg6[%c0_18, %c0_19] : memref<3x16xbf16, #tpu.memory_space<vmem>>, vector<3x16xbf16>
    %27 = arith.truncf %25 : vector<16x1536xf32> to vector<16x1536xbf16>
    %cst_20 = arith.constant dense<0.000000e+00> : vector<3x1536xf32>
    %28 = tpu.matmul %26, %27, %cst_20 {dimension_numbers = #tpu.dot_dimension_numbers<[1], [0], [0], [1], [0, 0, 1, 1], [], []>} : vector<3x16xbf16>, vector<16x1536xbf16>, vector<3x1536xf32> -> vector<3x1536xf32>
    %c0_21 = arith.constant 0 : index
    %c0_22 = arith.constant 0 : index
    %29 = vector.load %arg7[%c0_21, %c0_22] : memref<3x1xf32, #tpu.memory_space<vmem>>, vector<3x1xf32>
    %30 = vector.broadcast %29 : vector<3x1xf32> to vector<3x1536xf32>
    %31 = arith.addf %28, %30 : vector<3x1536xf32>
    %32 = arith.negf %31 : vector<3x1536xf32>
    %33 = math.exp %32 : vector<3x1536xf32>
    %cst_23 = arith.constant 1.000000e+00 : f32
    %34 = vector.broadcast %cst_23 : f32 to vector<3x1536xf32>
    %35 = arith.addf %34, %33 : vector<3x1536xf32>
    %36 = arith.divf %34, %35 : vector<3x1536xf32>
    %c1 = arith.constant 1 : index
    %c0_24 = arith.constant 0 : index
    %37 = vector.load %arg8[%c1, %c0_24] : memref<4x1536xf32, #tpu.memory_space<vmem>>, vector<3x1536xf32>
    tpu.vector_store %arg8[%c1, %c0_24], %36 {strides = array<i32>} : memref<4x1536xf32, #tpu.memory_space<vmem>>, vector<3x1536xf32>,
    return
  }
  func.func @transform_0(%arg0: i32) -> (i32, i32) {
    %c0_i32 = arith.constant 0 : i32
    %c0_i32_0 = arith.constant 0 : i32
    return %c0_i32, %arg0 : i32, i32
  }
  func.func @transform_1(%arg0: i32) -> (i32, i32) {
    %c0_i32 = arith.constant 0 : i32
    %c0_i32_0 = arith.constant 0 : i32
    %c0_i32_1 = arith.constant 0 : i32
    return %c0_i32, %c0_i32_0 : i32, i32
  }
  func.func @transform_2(%arg0: i32) -> (i32, i32) {
    %c0_i32 = arith.constant 0 : i32
    %c0_i32_0 = arith.constant 0 : i32
    %c0_i32_1 = arith.constant 0 : i32
    return %c0_i32, %c0_i32_0 : i32, i32
  }
  func.func @transform_3(%arg0: i32) -> (i32, i32) {
    %c0_i32 = arith.constant 0 : i32
    %c0_i32_0 = arith.constant 0 : i32
    %c0_i32_1 = arith.constant 0 : i32
    return %c0_i32, %c0_i32_0 : i32, i32
  }
  func.func @transform_4(%arg0: i32) -> (i32, i32) {
    %c0_i32 = arith.constant 0 : i32
    %c0_i32_0 = arith.constant 0 : i32
    %c0_i32_1 = arith.constant 0 : i32
    return %c0_i32, %c0_i32_0 : i32, i32
  }
  func.func @transform_5(%arg0: i32) -> (i32, i32) {
    %c0_i32 = arith.constant 0 : i32
    %c0_i32_0 = arith.constant 0 : i32
    %c0_i32_1 = arith.constant 0 : i32
    return %c0_i32, %c0_i32_0 : i32, i32
  }
  func.func @transform_6(%arg0: i32) -> (i32, i32) {
    %c0_i32 = arith.constant 0 : i32
    %c0_i32_0 = arith.constant 0 : i32
    %c0_i32_1 = arith.constant 0 : i32
    return %c0_i32, %c0_i32_0 : i32, i32
  }
  func.func @transform_7(%arg0: i32) -> (i32, i32) {
    %c0_i32 = arith.constant 0 : i32
    %c0_i32_0 = arith.constant 0 : i32
    return %c0_i32, %arg0 : i32, i32
  }
}

</mosaic_0001>

<bundles_post_ra>
// kernel: nerf_small_bg_forward.1
= control target key start
LH: loop header
LB: loop body
LE: loop exit
PB: predicated region body
PF: predicated region fallthrough
CT: control target
= control target key end

     0   :  { %s3032_s24 = smov 0   ;;  %s3707_s0 = inlined_call_operand.vmem [shape: f32[4,3072], index: 0, kind: input, shape index: {}]   ;;  %s3708_s1 = inlined_call_operand.vmem [shape: bf16[80,4], index: 1, kind: input, shape index: {}]   ;;  %s3709_s2 = inlined_call_operand.vmem [shape: bf16[64,64], index: 2, kind: input, shape index: {}]   ;;  %s3710_s3 = inlined_call_operand.vmem [shape: bf16[16,64], index: 3, kind: input, shape index: {}]   ;;  %s3711_s4 = inlined_call_operand.vmem [shape: bf16[16,16], index: 4, kind: input, shape index: {}]   ;;  %s3712_s5 = inlined_call_operand.vmem [shape: bf16[3,16], index: 5, kind: input, shape index: {}]   ;;  %s3713_s6 = inlined_call_operand.vmem [shape: f32[3,1], index: 6, kind: input, shape index: {}]   ;;  %s3714_s7 = inlined_call_operand.vmem [shape: f32[4,3072], index: 7, kind: output, shape index: {}]  }
   0x1 LB: > { %s2795_s25 = sadd.s32 4294967295, %s2988_s24   ;;  %p2799_p0 = scmp.ge.s32.totalorder %s2988_s24, 1  ;;  %s2988_s24 = sphi %s3032_s24, %s17_s24  }
   0x2   : > { %p238_p1 = scmp.lt.s32.totalorder %s2988_s24, 3 }
   0x4   : > { %p239_p2 = pnand %p2799_p0, %p238_p1 }
   0x6   : > { %242 = sbr.rel (%p239_p2) target bundleno = 1245 (0x4dd), region = 48 }
   0xb   : > { %s270_s26 = smul.u32 12, %s2795_s25  ;;  %v3715_v0 = vmov 0   ;;  %vm370_vm0 = vcmask 1041408   ;;  %v3058_v21 = vld [vmem:[%s3708_s1] sm:$0xff]   ;;  %vm354_vm1 = vcmask 31744   ;;  %v2920_v28 = vld [vmem:[%s3708_s1 + $0x8] sm:$0xff]  }
   0xc   : > { %439 = vmatprep.mubr.bf16.mxu0 %v3715_v0  ;;  %522 = vmatprep.mubr.bf16.mxu1 %v3715_v0  ;;  %v2921_v29 = vld [vmem:[%s3708_s1 + $0x10] sm:$0xff]   ;;  %v2924_v30 = vld [vmem:[%s3708_s1 + $0x18] sm:$0xff]   ;;  %v2925_v31 = vld [vmem:[%s3708_s1 + $0x20] sm:$0xff]   ;;  %vm1077_vm2 = vcmask 523264   ;;  %vm2077_vm3 = vcmask 130048  }
   0xd   : > { %p271_p3 = scmp.lt.s32.totalorder %s270_s26, 23  ;;  %2916 = vset.pattern.permute.xlu0 %v3715_v0 }
   0xf   : > { %s3743_s26 = smov (!%p271_p3, %s270_s26), 23 }
  0x10   : > { %s2800_s27 = sshll.u32 %s3743_s26, 2 }
  0x11   : > { %s274_s30 = scalar_lea.vmem %s3707_s0, %s2800_s27  ;;  %s3616_s12 = scalar_lea.vmem %s3714_s7, %s2800_s27 }
  0x12   : > { %v283_v1 = vld [vmem:[%s274_s30] sm:$0xff]  ;;  %v284_v2 = vld [vmem:[%s274_s30 + $0x8] sm:$0xff]  ;;  %v285_v3 = vld [vmem:[%s274_s30 + $0x10] sm:$0xff] }
  0x13   : > { %v295_v4 = vcombine.high %v283_v1, %v283_v1  ;;  %v296_v5 = vcombine.high %v284_v2, %v284_v2  ;;  %v307_v6 = vpack.c.bf16 %v283_v1, %v283_v1  ;;  %v309_v7 = vpack.c.bf16 %v284_v2, %v284_v2  ;;  %v286_v8 = vld [vmem:[%s274_s30 + $0x18] sm:$0xff]  ;;  %v287_v9 = vld [vmem:[%s274_s30 + $0x20] sm:$0xff]  ;;  %v288_v10 = vld [vmem:[%s274_s30 + $0x28] sm:$0xff] }
  0x14   : > { %v297_v11 = vcombine.high %v285_v3, %v285_v3  ;;  %v298_v12 = vcombine.high %v286_v8, %v286_v8  ;;  %v311_v19 = vpack.c.bf16 %v285_v3, %v285_v3  ;;  %v313_v20 = vpack.c.bf16 %v286_v8, %v286_v8 }
  0x15   : > { %v308_v13 = vpack.c.bf16 %v295_v4, %v295_v4  ;;  %v310_v14 = vpack.c.bf16 %v296_v5, %v296_v5  ;;  %v372_v15 = vsel %vm370_vm0, %v307_v6, 0  ;;  %v378_v16 = vsel %vm370_vm0, %v309_v7, 0 }
  0x16   : > { %v312_v17 = vpack.c.bf16 %v297_v11, %v297_v11  ;;  %v314_v18 = vpack.c.bf16 %v298_v12, %v298_v12  ;;  %v299_v22 = vcombine.high %v287_v9, %v287_v9  ;;  %v300_v23 = vcombine.high %v288_v10, %v288_v10 }
  0x17   : > { %2807 = vmatprep.subr.msk.bf16.mxu0 %vm370_vm0, %v308_v13  ;;  %2813 = vmatprep.subr.msk.bf16.mxu1 %vm370_vm0, %v310_v14  ;;  %v384_v24 = vsel %vm370_vm0, %v311_v19, 0  ;;  %v390_v25 = vsel %vm370_vm0, %v313_v20, 0  ;;  %v315_v32 = vpack.c.bf16 %v287_v9, %v287_v9  ;;  %v317_v33 = vpack.c.bf16 %v288_v10, %v288_v10 }
  0x18   : > { %422 = vmatpush1.bf16.msra.mxu0 %v372_v15  ;;  %505 = vmatpush1.bf16.msra.mxu1 %v378_v16  ;;  %v316_v26 = vpack.c.bf16 %v299_v22, %v299_v22  ;;  %v318_v27 = vpack.c.bf16 %v300_v23, %v300_v23 }
  0x19   : > { %2819 = vmatprep.subr.msk.bf16.mxu0 %vm370_vm0, %v312_v17  ;;  %2825 = vmatprep.subr.msk.bf16.mxu1 %vm370_vm0, %v314_v18  ;;  %v396_v34 = vsel %vm370_vm0, %v315_v32, 0  ;;  %v402_v35 = vsel %vm370_vm0, %v317_v33, 0 }
  0x1b   : > { %2808 = vmatmul.mubr.msk.bf16.vlgmr.msra.gmra.mxu0 %vm354_vm1, %v3058_v21  ;;  %2814 = vmatmul.mubr.msk.bf16.vlgmr.msra.gmra.mxu1 %vm354_vm1, %v3058_v21 }
  0x1c   : > { %449 = vmatprep.mubr.bf16.mxu0 %v3715_v0  ;;  %532 = vmatprep.mubr.bf16.mxu1 %v3715_v0 }
  0x1d   : > { %588 = vmatpush1.bf16.msra.mxu0 %v384_v24  ;;  %671 = vmatpush1.bf16.msra.mxu1 %v390_v25 }
  0x1e   : > { %2831 = vmatprep.subr.msk.bf16.mxu0 %vm370_vm0, %v316_v26  ;;  %2837 = vmatprep.subr.msk.bf16.mxu1 %vm370_vm0, %v318_v27 }
  0x23   : > { %2809 = vmatmul.mubr.msk.bf16.gmra.mxu0 %vm354_vm1, %v2920_v28  ;;  %2815 = vmatmul.mubr.msk.bf16.gmra.mxu1 %vm354_vm1, %v2920_v28 }
  0x24   : > { %459 = vmatprep.mubr.bf16.mxu0 %v3715_v0  ;;  %542 = vmatprep.mubr.bf16.mxu1 %v3715_v0 }
  0x2b   : > { %2810 = vmatmul.mubr.msk.bf16.gmra.mxu0 %vm354_vm1, %v2921_v29  ;;  %2816 = vmatmul.mubr.msk.bf16.gmra.mxu1 %vm354_vm1, %v2921_v29 }
  0x2c   : > { %469 = vmatprep.mubr.bf16.mxu0 %v3715_v0  ;;  %552 = vmatprep.mubr.bf16.mxu1 %v3715_v0 }
  0x33   : > { %2811 = vmatmul.mubr.msk.bf16.gmra.mxu0 %vm354_vm1, %v2924_v30  ;;  %2817 = vmatmul.mubr.msk.bf16.gmra.mxu1 %vm354_vm1, %v2924_v30 }
  0x34   : > { %479 = vmatprep.mubr.bf16.mxu0 %v3715_v0  ;;  %562 = vmatprep.mubr.bf16.mxu1 %v3715_v0 }
  0x3b   : > { %2812 = vmatmul.mubr.msk.bf16.gmra.mxu0 %vm354_vm1, %v2925_v31  ;;  %2818 = vmatmul.mubr.msk.bf16.gmra.mxu1 %vm354_vm1, %v2925_v31 }
  0x3c   : > { %605 = vmatprep.mubr.bf16.mxu0 %v3715_v0  ;;  %688 = vmatprep.mubr.bf16.mxu1 %v3715_v0 }
  0x43   : > { %2820 = vmatmul.mubr.msk.bf16.vlgmr.msra.gmra.mxu0 %vm354_vm1, %v3058_v21  ;;  %2826 = vmatmul.mubr.msk.bf16.vlgmr.msra.gmra.mxu1 %vm354_vm1, %v3058_v21 }
  0x44   : > { %615 = vmatprep.mubr.bf16.mxu0 %v3715_v0  ;;  %698 = vmatprep.mubr.bf16.mxu1 %v3715_v0 }
  0x45   : > { %754 = vmatpush1.bf16.msra.mxu0 %v396_v34  ;;  %837 = vmatpush1.bf16.msra.mxu1 %v402_v35 }
  0x4b   : > { %2821 = vmatmul.mubr.msk.bf16.gmra.mxu0 %vm354_vm1, %v2920_v28  ;;  %2827 = vmatmul.mubr.msk.bf16.gmra.mxu1 %vm354_vm1, %v2920_v28 }
  0x4c   : > { %625 = vmatprep.mubr.bf16.mxu0 %v3715_v0  ;;  %708 = vmatprep.mubr.bf16.mxu1 %v3715_v0 }
  0x53   : > { %2822 = vmatmul.mubr.msk.bf16.gmra.mxu0 %vm354_vm1, %v2921_v29  ;;  %2828 = vmatmul.mubr.msk.bf16.gmra.mxu1 %vm354_vm1, %v2921_v29 }
  0x54   : > { %635 = vmatprep.mubr.bf16.mxu0 %v3715_v0  ;;  %718 = vmatprep.mubr.bf16.mxu1 %v3715_v0 }
  0x5b   : > { %2823 = vmatmul.mubr.msk.bf16.gmra.mxu0 %vm354_vm1, %v2924_v30  ;;  %2829 = vmatmul.mubr.msk.bf16.gmra.mxu1 %vm354_vm1, %v2924_v30 }
  0x5c   : > { %645 = vmatprep.mubr.bf16.mxu0 %v3715_v0  ;;  %728 = vmatprep.mubr.bf16.mxu1 %v3715_v0 }
  0x63   : > { %2824 = vmatmul.mubr.msk.bf16.gmra.mxu0 %vm354_vm1, %v2925_v31  ;;  %2830 = vmatmul.mubr.msk.bf16.gmra.mxu1 %vm354_vm1, %v2925_v31 }
  0x64   : > { %771 = vmatprep.mubr.bf16.mxu0 %v3715_v0  ;;  %854 = vmatprep.mubr.bf16.mxu1 %v3715_v0 }
  0x6b   : > { %2832 = vmatmul.mubr.msk.bf16.vlgmr.msra.gmra.mxu0 %vm354_vm1, %v3058_v21  ;;  %2838 = vmatmul.mubr.msk.bf16.vlgmr.msra.gmra.mxu1 %vm354_vm1, %v3058_v21 }
  0x6c   : > { %781 = vmatprep.mubr.bf16.mxu0 %v3715_v0  ;;  %864 = vmatprep.mubr.bf16.mxu1 %v3715_v0 }
  0x73   : > { %2833 = vmatmul.mubr.msk.bf16.gmra.mxu0 %vm354_vm1, %v2920_v28  ;;  %2839 = vmatmul.mubr.msk.bf16.gmra.mxu1 %vm354_vm1, %v2920_v28 }
  0x74   : > { %791 = vmatprep.mubr.bf16.mxu0 %v3715_v0  ;;  %874 = vmatprep.mubr.bf16.mxu1 %v3715_v0 }
  0x7b   : > { %2834 = vmatmul.mubr.msk.bf16.gmra.mxu0 %vm354_vm1, %v2921_v29  ;;  %2840 = vmatmul.mubr.msk.bf16.gmra.mxu1 %vm354_vm1, %v2921_v29 }
  0x7c   : > { %801 = vmatprep.mubr.bf16.mxu0 %v3715_v0  ;;  %884 = vmatprep.mubr.bf16.mxu1 %v3715_v0 }
  0x83   : > { %2835 = vmatmul.mubr.msk.bf16.gmra.mxu0 %vm354_vm1, %v2924_v30  ;;  %2841 = vmatmul.mubr.msk.bf16.gmra.mxu1 %vm354_vm1, %v2924_v30 }
  0x84   : > { %811 = vmatprep.mubr.bf16.mxu0 %v3715_v0  ;;  %894 = vmatprep.mubr.bf16.mxu1 %v3715_v0 }
  0x8b   : > { %2836 = vmatmul.mubr.msk.bf16.gmra.mxu0 %vm354_vm1, %v2925_v31  ;;  %2842 = vmatmul.mubr.msk.bf16.gmra.mxu1 %vm354_vm1, %v2925_v31 }
  0x8c   : > { %1122 = vmatprep.mubr.bf16.mxu0 %v3715_v0  ;;  %1195 = vmatprep.mubr.bf16.mxu1 %v3715_v0 }
  0xdb   : > { %v3146_v36 = vpop.f32.mrf.mxu0  ;;  %v3148_v37 = vpop.f32.mrf.mxu1 }
  0xdd   : > { %v3150_v38 = vpop.f32.mrf.mxu0  ;;  %v3152_v39 = vpop.f32.mrf.mxu1 }
  0xdf   : > { %v3154_v40 = vpop.f32.mrf.mxu0  ;;  %v3156_v41 = vpop.f32.mrf.mxu1 }
  0xe1   : > { %v3158_v42 = vpop.f32.mrf.mxu0  ;;  %v3160_v43 = vpop.f32.mrf.mxu1 }
  0xe3   : > { %v3162_v44 = vpop.f32.mrf.mxu0  ;;  %v3164_v45 = vpop.f32.mrf.mxu1 }
  0xe5   : > { %v3166_v46 = vpop.f32.mrf.mxu0  ;;  %v3168_v47 = vpop.f32.mrf.mxu1 }
  0xe6   : > { %v930_v35 = vmax.f32 %v3166_v46, 0.0 }
  0xe7   : > { %v3170_v48 = vpop.f32.mrf.mxu0  ;;  %v3172_v49 = vpop.f32.mrf.mxu1 }
  0xe9   : > { %v3174_v50 = vpop.f32.mrf.mxu0  ;;  %v3176_v51 = vpop.f32.mrf.mxu1 }
  0xea   : > { %v942_v27 = vmax.f32 %v3174_v50, 0.0  ;;  %v944_v28 = vmax.f32 %v3176_v51, 0.0  ;;  %v941_v50 = vmax.f32 %v3170_v48, 0.0  ;;  %v943_v51 = vmax.f32 %v3172_v49, 0.0 }
  0xeb   : > { %v461_v52 = vpop.f32.mrf.mxu0  ;;  %v544_v53 = vpop.f32.mrf.mxu1  ;;  %v906_v49 = vmax.f32 %v3150_v38, 0.0  ;;  %v907_v38 = vmax.f32 %v3148_v37, 0.0 }
  0xec   : > { %v953_v31 = vmax.f32 %v461_v52, 0.0  ;;  %v955_v32 = vmax.f32 %v544_v53, 0.0 }
  0xed   : > { %v463_v54 = vpop.f32.mrf.mxu0  ;;  %v546_v55 = vpop.f32.mrf.mxu1 }
  0xee   : > { %v954_v17 = vmax.f32 %v463_v54, 0.0  ;;  %v956_v18 = vmax.f32 %v546_v55, 0.0  ;;  %v932_v54 = vmax.f32 %v3168_v47, 0.0  ;;  %v929_v47 = vmax.f32 %v3162_v44, 0.0 }
  0xef   : > { %v465_v56 = vpop.f32.mrf.mxu0  ;;  %v548_v57 = vpop.f32.mrf.mxu1 }
  0xf0   : > { %v965_v21 = vmax.f32 %v465_v56, 0.0  ;;  %v967_v22 = vmax.f32 %v548_v57, 0.0  ;;  %v918_v57 = vmax.f32 %v3158_v42, 0.0  ;;  %v1024_v46 = vpack.c.bf16 %v944_v28, %v932_v54  ;;  %v3275_v28 = vld [vmem:[%s3709_s2 + $0x10] sm:$0xff]  }
  0xf1   : > { %v467_v58 = vpop.f32.mrf.mxu0  ;;  %v550_v59 = vpop.f32.mrf.mxu1  ;;  %v917_v42 = vmax.f32 %v3154_v40, 0.0 }
  0xf2   : > { %v966_v3 = vmax.f32 %v467_v58, 0.0  ;;  %v968_v4 = vmax.f32 %v550_v59, 0.0  ;;  %v1033_v55 = vpack.c.bf16 %v965_v21, %v953_v31  ;;  %v1035_v56 = vpack.c.bf16 %v967_v22, %v955_v32 }
  0xf3   : > { %v471_v60 = vpop.f32.mrf.mxu0  ;;  %v554_v61 = vpop.f32.mrf.mxu1  ;;  %v920_v58 = vmax.f32 %v3160_v43, 0.0  ;;  %v1022_v59 = vpack.c.bf16 %v942_v27, %v930_v35  ;;  %v919_v43 = vmax.f32 %v3156_v41, 0.0 }
  0xf4   : > { %v977_v13 = vmax.f32 %v471_v60, 0.0  ;;  %v979_v14 = vmax.f32 %v554_v61, 0.0  ;;  %v1034_v29 = vpack.c.bf16 %v966_v3, %v954_v17  ;;  %v1036_v30 = vpack.c.bf16 %v968_v4, %v956_v18  ;;  %v3256_v17 = vld [vmem:[%s3709_s2 + $0x8] sm:$0xff]  }
  0xf5   : > { %v473_v62 = vpop.f32.mrf.mxu0  ;;  %v556_v63 = vpop.f32.mrf.mxu1  ;;  %v931_v60 = vmax.f32 %v3164_v45, 0.0  ;;  %v905_v4 = vmax.f32 %v3146_v36, 0.0  ;;  %v1011_v41 = vpack.c.bf16 %v919_v43, %v907_v38  ;;  %v3229_v36 = vld [vmem:[%s3709_s2] sm:$0xff]  }
  0xf6   : > { %v978_v9 = vmax.f32 %v473_v62, 0.0  ;;  %v980_v10 = vmax.f32 %v556_v63, 0.0  ;;  %v908_v62 = vmax.f32 %v3152_v39, 0.0  ;;  %v1021_v63 = vpack.c.bf16 %v941_v50, %v929_v47  ;;  %v3286_v47 = vld [vmem:[%s3709_s2 + $0x18] sm:$0xff]  }
  0xf7   : > { %v475_v1 = vpop.f32.mrf.mxu0  ;;  %v558_v2 = vpop.f32.mrf.mxu1  ;;  %v1023_v44 = vpack.c.bf16 %v943_v51, %v931_v60  ;;  %v1009_v40 = vpack.c.bf16 %v917_v42, %v905_v4 }
  0xf8   : > { %v989_v5 = vmax.f32 %v475_v1, 0.0  ;;  %v991_v6 = vmax.f32 %v558_v2, 0.0  ;;  %v1010_v2 = vpack.c.bf16 %v918_v57, %v906_v49  ;;  %v1012_v3 = vpack.c.bf16 %v920_v58, %v908_v62 }
  0xf9   : > { %v477_v7 = vpop.f32.mrf.mxu0  ;;  %v560_v8 = vpop.f32.mrf.mxu1 }
  0xfa   : > { %v990_v11 = vmax.f32 %v477_v7, 0.0  ;;  %v992_v12 = vmax.f32 %v560_v8, 0.0  ;;  %v1045_v23 = vpack.c.bf16 %v989_v5, %v977_v13  ;;  %v1047_v24 = vpack.c.bf16 %v991_v6, %v979_v14 }
  0xfb   : > { %v3178_v15 = vpop.f32.mrf.mxu0  ;;  %v3180_v16 = vpop.f32.mrf.mxu1 }
  0xfc   : > { %v1046_v19 = vpack.c.bf16 %v990_v11, %v978_v9  ;;  %v1048_v20 = vpack.c.bf16 %v992_v12, %v980_v10 }
  0xfd   : > { %v3182_v25 = vpop.f32.mrf.mxu0  ;;  %v3184_v26 = vpop.f32.mrf.mxu1 }
  0xfe   : > { %1098 = vmatprep.subr.bf16.mxu0 %v1046_v19  ;;  %1171 = vmatprep.subr.bf16.mxu1 %v1048_v20 }
  0xff   : > { %v3188_v33 = vpop.f32.mrf.mxu0  ;;  %v3190_v34 = vpop.f32.mrf.mxu1  ;;  %1099 = vmatpush1.bf16.msra.mxu0 %v1045_v23  ;;  %1172 = vmatpush1.bf16.msra.mxu1 %v1047_v24 }
 0x100   : > { %1100 = vmatprep.subr.bf16.mxu0 %v1034_v29  ;;  %1173 = vmatprep.subr.bf16.mxu1 %v1036_v30 }
 0x101   : > { %v3196_v52 = vpop.f32.mrf.mxu0  ;;  %v3198_v53 = vpop.f32.mrf.mxu1 }
 0x103   : > { %v3204_v61 = vpop.f32.mrf.mxu0  ;;  %v3206_v48 = vpop.f32.mrf.mxu1  ;;  %1101 = vmatpush1.bf16.msra.mxu0 %v1033_v55  ;;  %1174 = vmatpush1.bf16.msra.mxu1 %v1035_v56 }
 0x104   : > { %1102 = vmatprep.subr.bf16.mxu0 %v1022_v59  ;;  %1175 = vmatprep.subr.bf16.mxu1 %v1024_v46 }
 0x105   : > { %v3212_v1 = vpop.f32.mrf.mxu0  ;;  %v3214_v45 = vpop.f32.mrf.mxu1 }
 0x107   : > { %v3218_v5 = vpop.f32.mrf.mxu0  ;;  %v3220_v39 = vpop.f32.mrf.mxu1  ;;  %1103 = vmatpush1.bf16.msra.mxu0 %v1021_v63  ;;  %1176 = vmatpush1.bf16.msra.mxu1 %v1023_v44 }
 0x108   : > { %1104 = vmatprep.subr.bf16.mxu0 %v1010_v2  ;;  %1177 = vmatprep.subr.bf16.mxu1 %v1012_v3 }
 0x109   : > { %v3222_v6 = vpop.f32.mrf.mxu0  ;;  %v3224_v7 = vpop.f32.mrf.mxu1 }
 0x10b   : > { %v3231_v37 = vpop.f32.mrf.mxu0  ;;  %v3233_v8 = vpop.f32.mrf.mxu1  ;;  %1105 = vmatpush1.bf16.msra.mxu0 %v1009_v40  ;;  %1178 = vmatpush1.bf16.msra.mxu1 %v1011_v41 }
 0x10d   : > { %v3235_v9 = vpop.f32.mrf.mxu0  ;;  %v3237_v10 = vpop.f32.mrf.mxu1 }
 0x10e   : > { %2847 = vmatmul.mubr.msk.bf16.vlgmr.msra.gmra.mxu0 %vm1077_vm2, %v3229_v36  ;;  %2851 = vmatmul.mubr.msk.bf16.vlgmr.msra.gmra.mxu1 %vm1077_vm2, %v3229_v36 }
 0x10f   : > { %v3243_v11 = vpop.f32.mrf.mxu0  ;;  %v3245_v12 = vpop.f32.mrf.mxu1  ;;  %1132 = vmatprep.mubr.bf16.mxu0 %v3715_v0  ;;  %1205 = vmatprep.mubr.bf16.mxu1 %v3715_v0 }
 0x111   : > { %v3249_v13 = vpop.f32.mrf.mxu0  ;;  %v3251_v14 = vpop.f32.mrf.mxu1 }
 0x113   : > { %v3258_v18 = vpop.f32.mrf.mxu0  ;;  %v3260_v19 = vpop.f32.mrf.mxu1 }
 0x115   : > { %v629_v20 = vpop.f32.mrf.mxu0  ;;  %v712_v21 = vpop.f32.mrf.mxu1 }
 0x116   : > { %2848 = vmatmul.mubr.msk.bf16.gmra.mxu0 %vm1077_vm2, %v3256_v17  ;;  %2852 = vmatmul.mubr.msk.bf16.gmra.mxu1 %vm1077_vm2, %v3256_v17  ;;  %v958_v3 = vmax.f32 %v629_v20, 0.0  ;;  %v960_v4 = vmax.f32 %v712_v21, 0.0  ;;  %v948_v20 = vmax.f32 %v3251_v14, 0.0 }
 0x117   : > { %v3266_v22 = vpop.f32.mrf.mxu0  ;;  %v3268_v23 = vpop.f32.mrf.mxu1  ;;  %1142 = vmatprep.mubr.bf16.mxu0 %v3715_v0  ;;  %1215 = vmatprep.mubr.bf16.mxu1 %v3715_v0 }
 0x118   : > { %v969_v41 = vmax.f32 %v3266_v22, 0.0 }
 0x119   : > { %v633_v24 = vpop.f32.mrf.mxu0  ;;  %v716_v27 = vpop.f32.mrf.mxu1 }
 0x11a   : > { %v970_v60 = vmax.f32 %v633_v24, 0.0  ;;  %v972_v49 = vmax.f32 %v716_v27, 0.0 }
 0x11b   : > { %v637_v29 = vpop.f32.mrf.mxu0  ;;  %v720_v30 = vpop.f32.mrf.mxu1 }
 0x11c   : > { %v981_v43 = vmax.f32 %v637_v29, 0.0  ;;  %v983_v63 = vmax.f32 %v720_v30, 0.0  ;;  %v946_v29 = vmax.f32 %v3249_v13, 0.0  ;;  %v1038_v21 = vpack.c.bf16 %v970_v60, %v958_v3 }
 0x11d   : > { %v639_v31 = vpop.f32.mrf.mxu0  ;;  %v722_v32 = vpop.f32.mrf.mxu1  ;;  %v1040_v30 = vpack.c.bf16 %v972_v49, %v960_v4  ;;  %v936_v13 = vmax.f32 %v3237_v10, 0.0  ;;  %v924_v10 = vmax.f32 %v3224_v7, 0.0  ;;  %v912_v60 = vmax.f32 %v3214_v45, 0.0 }
 0x11e   : > { %2849 = vmatmul.mubr.msk.bf16.gmra.mxu0 %vm1077_vm2, %v3275_v28  ;;  %2853 = vmatmul.mubr.msk.bf16.gmra.mxu1 %vm1077_vm2, %v3275_v28  ;;  %v982_v50 = vmax.f32 %v639_v31, 0.0  ;;  %v984_v51 = vmax.f32 %v722_v32, 0.0  ;;  %v971_v31 = vmax.f32 %v3268_v23, 0.0  ;;  %v957_v23 = vmax.f32 %v3258_v18, 0.0 }
 0x11f   : > { %v641_v35 = vpop.f32.mrf.mxu0  ;;  %v724_v54 = vpop.f32.mrf.mxu1  ;;  %1152 = vmatprep.mubr.bf16.mxu0 %v3715_v0  ;;  %1225 = vmatprep.mubr.bf16.mxu1 %v3715_v0  ;;  %v921_v49 = vmax.f32 %v3218_v5, 0.0  ;;  %v911_v45 = vmax.f32 %v3206_v48, 0.0 }
 0x120   : > { %v993_v57 = vmax.f32 %v641_v35, 0.0  ;;  %v995_v58 = vmax.f32 %v724_v54, 0.0  ;;  %v959_v35 = vmax.f32 %v3260_v19, 0.0  ;;  %v934_v54 = vmax.f32 %v3235_v9, 0.0 }
 0x121   : > { %v643_v55 = vpop.f32.mrf.mxu0  ;;  %v726_v56 = vpop.f32.mrf.mxu1  ;;  %v922_v9 = vmax.f32 %v3222_v6, 0.0 }
 0x122   : > { %v994_v59 = vmax.f32 %v643_v55, 0.0  ;;  %v996_v46 = vmax.f32 %v726_v56, 0.0  ;;  %v1049_v24 = vpack.c.bf16 %v993_v57, %v981_v43  ;;  %v1051_v27 = vpack.c.bf16 %v995_v58, %v983_v63 }
 0x123   : > { %v3288_v62 = vpop.f32.mrf.mxu0  ;;  %v3290_v42 = vpop.f32.mrf.mxu1  ;;  %v947_v55 = vmax.f32 %v3245_v12, 0.0  ;;  %v1037_v56 = vpack.c.bf16 %v969_v41, %v957_v23  ;;  %v1039_v18 = vpack.c.bf16 %v971_v31, %v959_v35  ;;  %v1026_v19 = vpack.c.bf16 %v946_v29, %v934_v54 }
 0x124   : > { %3717 = vst [vmem:[#allocation2_spill] sm:$0xff] %v3288_v62  ;;  %3718 = vst [vmem:[#allocation3_spill] sm:$0xff] %v3290_v42  ;;  %v1050_v44 = vpack.c.bf16 %v994_v59, %v982_v50  ;;  %v1052_v2 = vpack.c.bf16 %v996_v46, %v984_v51  ;;  %v945_v51 = vmax.f32 %v3243_v11, 0.0  ;;  %v1028_v57 = vpack.c.bf16 %v948_v20, %v936_v13 }
 0x125   : > { %v3292_v38 = vpop.f32.mrf.mxu0  ;;  %v3294_v40 = vpop.f32.mrf.mxu1  ;;  %v933_v11 = vmax.f32 %v3231_v37, 0.0  ;;  %v935_v12 = vmax.f32 %v3233_v8, 0.0  ;;  %v910_v46 = vmax.f32 %v3212_v1, 0.0  ;;  %v923_v43 = vmax.f32 %v3220_v39, 0.0 }
 0x126   : > { %2850 = vmatmul.mubr.msk.bf16.gmra.mxu0 %vm1077_vm2, %v3286_v47  ;;  %2854 = vmatmul.mubr.msk.bf16.gmra.mxu1 %vm1077_vm2, %v3286_v47  ;;  %v1016_v8 = vpack.c.bf16 %v924_v10, %v912_v60  ;;  %v909_v1 = vmax.f32 %v3204_v61, 0.0 }
 0x127   : > { %1244 = vmatprep.subr.bf16.mxu0 %v1050_v44  ;;  %1317 = vmatprep.subr.bf16.mxu1 %v1052_v2  ;;  %v3304_v32 = vpop.f32.mrf.mxu0  ;;  %v3306_v22 = vpop.f32.mrf.mxu1  ;;  %v1025_v63 = vpack.c.bf16 %v945_v51, %v933_v11  ;;  %v1027_v37 = vpack.c.bf16 %v947_v55, %v935_v12  ;;  %v1014_v44 = vpack.c.bf16 %v922_v9, %v910_v46 }
 0x128   : > { %3719 = vst [vmem:[#allocation4_spill] sm:$0xff] %v3304_v32  ;;  %3720 = vst [vmem:[#allocation5_spill] sm:$0xff] %v3306_v22  ;;  %1245 = vmatpush1.bf16.msra.mxu0 %v1049_v24  ;;  %1318 = vmatpush1.bf16.msra.mxu1 %v1051_v27  ;;  %v1013_v39 = vpack.c.bf16 %v921_v49, %v909_v1  ;;  %v1015_v41 = vpack.c.bf16 %v923_v43, %v911_v45 }
 0x129   : > { %1246 = vmatprep.subr.bf16.mxu0 %v1038_v21  ;;  %1319 = vmatprep.subr.bf16.mxu1 %v1040_v30  ;;  %v3312_v14 = vpop.f32.mrf.mxu0  ;;  %v3314_v50 = vpop.f32.mrf.mxu1 }
 0x12a   : > { %3721 = vst [vmem:[#allocation6_spill] sm:$0xff] %v3312_v14  ;;  %3722 = vst [vmem:[#allocation7_spill] sm:$0xff] %v3314_v50  ;;  %1268 = vmatprep.mubr.bf16.mxu0 %v3715_v0  ;;  %1341 = vmatprep.mubr.bf16.mxu1 %v3715_v0 }
 0x12b   : > { %v3322_v58 = vpop.f32.mrf.mxu0  ;;  %v3324_v59 = vpop.f32.mrf.mxu1 }
 0x12c   : > { %1247 = vmatpush1.bf16.msra.mxu0 %v1037_v56  ;;  %1320 = vmatpush1.bf16.msra.mxu1 %v1039_v18 }
 0x12d   : > { %1248 = vmatprep.subr.bf16.mxu0 %v1026_v19  ;;  %1321 = vmatprep.subr.bf16.mxu1 %v1028_v57  ;;  %v3330_v6 = vpop.f32.mrf.mxu0  ;;  %v3332_v7 = vpop.f32.mrf.mxu1 }
 0x12f   : > { %v3336_v2 = vpop.f32.mrf.mxu0  ;;  %v3338_v3 = vpop.f32.mrf.mxu1 }
 0x130   : > { %1249 = vmatpush1.bf16.msra.mxu0 %v1025_v63  ;;  %1322 = vmatpush1.bf16.msra.mxu1 %v1027_v37 }
 0x131   : > { %1250 = vmatprep.subr.bf16.mxu0 %v1014_v44  ;;  %1323 = vmatprep.subr.bf16.mxu1 %v1016_v8  ;;  %v3342_v4 = vpop.f32.mrf.mxu0  ;;  %v3344_v5 = vpop.f32.mrf.mxu1 }
 0x133   : > { %v3346_v31 = vpop.f32.mrf.mxu0  ;;  %v3348_v24 = vpop.f32.mrf.mxu1 }
 0x134   : > { %1251 = vmatpush1.bf16.msra.mxu0 %v1013_v39  ;;  %1324 = vmatpush1.bf16.msra.mxu1 %v1015_v41 }
 0x135   : > { %v3350_v27 = vpop.f32.mrf.mxu0  ;;  %v3352_v61 = vpop.f32.mrf.mxu1 }
 0x137   : > { %2855 = vmatmul.mubr.msk.bf16.vlgmr.msra.gmra.mxu0 %vm1077_vm2, %v3229_v36  ;;  %2859 = vmatmul.mubr.msk.bf16.vlgmr.msra.gmra.mxu1 %vm1077_vm2, %v3229_v36  ;;  %v3358_v48 = vpop.f32.mrf.mxu0  ;;  %v3360_v29 = vpop.f32.mrf.mxu1 }
 0x138   : > { %1278 = vmatprep.mubr.bf16.mxu0 %v3715_v0  ;;  %1351 = vmatprep.mubr.bf16.mxu1 %v3715_v0 }
 0x139   : > { %v3364_v20 = vpop.f32.mrf.mxu0  ;;  %v3366_v21 = vpop.f32.mrf.mxu1 }
 0x13b   : > { %v793_v30 = vpop.f32.mrf.mxu0  ;;  %v876_v23 = vpop.f32.mrf.mxu1 }
 0x13d   : > { %v795_v35 = vpop.f32.mrf.mxu0  ;;  %v878_v54 = vpop.f32.mrf.mxu1 }
 0x13e   : > { %v962_v14 = vmax.f32 %v795_v35, 0.0  ;;  %v964_v42 = vmax.f32 %v878_v54, 0.0  ;;  %v961_v35 = vmax.f32 %v793_v30, 0.0  ;;  %v963_v54 = vmax.f32 %v876_v23, 0.0 }
 0x13f   : > { %2856 = vmatmul.mubr.msk.bf16.gmra.mxu0 %vm1077_vm2, %v3256_v17  ;;  %2860 = vmatmul.mubr.msk.bf16.gmra.mxu1 %vm1077_vm2, %v3256_v17  ;;  %v797_v13 = vpop.f32.mrf.mxu0  ;;  %v880_v51 = vpop.f32.mrf.mxu1  ;;  %v926_v30 = vmax.f32 %v3342_v4, 0.0  ;;  %v939_v23 = vmax.f32 %v3348_v24, 0.0  ;;  %v927_v4 = vmax.f32 %v3338_v3, 0.0  ;;  %v915_v24 = vmax.f32 %v3324_v59, 0.0 }
 0x140   : > { %1288 = vmatprep.mubr.bf16.mxu0 %v3715_v0  ;;  %1361 = vmatprep.mubr.bf16.mxu1 %v3715_v0  ;;  %v973_v62 = vmax.f32 %v797_v13, 0.0  ;;  %v975_v22 = vmax.f32 %v880_v51, 0.0  ;;  %v938_v13 = vmax.f32 %v3350_v27, 0.0  ;;  %v3723_v51 = vmov 0  }
 0x141   : > { %v799_v55 = vpop.f32.mrf.mxu0  ;;  %v882_v56 = vpop.f32.mrf.mxu1 }
 0x142   : > { %v974_v8 = vmax.f32 %v799_v55, 0.0  ;;  %v976_v1 = vmax.f32 %v882_v56, 0.0 }
 0x143   : > { %v803_v18 = vpop.f32.mrf.mxu0  ;;  %v886_v9 = vpop.f32.mrf.mxu1 }
 0x144   : > { %v985_v45 = vmax.f32 %v803_v18, 0.0  ;;  %v987_v39 = vmax.f32 %v886_v9, 0.0 }
 0x145   : > { %v805_v10 = vpop.f32.mrf.mxu0  ;;  %v888_v19 = vpop.f32.mrf.mxu1 }
 0x146   : > { %v986_v12 = vmax.f32 %v805_v10, 0.0  ;;  %v988_v46 = vmax.f32 %v888_v19, 0.0  ;;  %v950_v10 = vmax.f32 %v3364_v20, 0.0  ;;  %v952_v19 = vmax.f32 %v3366_v21, 0.0 }
 0x147   : > { %2857 = vmatmul.mubr.msk.bf16.gmra.mxu0 %vm1077_vm2, %v3275_v28  ;;  %2861 = vmatmul.mubr.msk.bf16.gmra.mxu1 %vm1077_vm2, %v3275_v28  ;;  %v807_v57 = vpop.f32.mrf.mxu0  ;;  %v890_v11 = vpop.f32.mrf.mxu1  ;;  %v949_v20 = vmax.f32 %v3358_v48, 0.0  ;;  %v1043_v21 = vpack.c.bf16 %v975_v22, %v963_v54  ;;  %v914_v48 = vmax.f32 %v3330_v6, 0.0  ;;  %v925_v22 = vmax.f32 %v3336_v2, 0.0 }
 0x148   : > { %1298 = vmatprep.mubr.bf16.mxu0 %v3715_v0  ;;  %1371 = vmatprep.mubr.bf16.mxu1 %v3715_v0  ;;  %v997_v43 = vmax.f32 %v807_v57, 0.0  ;;  %v999_v63 = vmax.f32 %v890_v11, 0.0  ;;  %v1042_v57 = vpack.c.bf16 %v974_v8, %v962_v14  ;;  %v1044_v11 = vpack.c.bf16 %v976_v1, %v964_v42 }
 0x149   : > { %v809_v60 = vpop.f32.mrf.mxu0  ;;  %v892_v49 = vpop.f32.mrf.mxu1  ;;  %v951_v42 = vmax.f32 %v3360_v29, 0.0  ;;  %v1041_v14 = vpack.c.bf16 %v973_v62, %v961_v35  ;;  %v916_v62 = vmax.f32 %v3332_v7, 0.0  ;;  %v1018_v55 = vpack.c.bf16 %v926_v30, %v914_v48 }
 0x14a   : > { %v998_v37 = vmax.f32 %v809_v60, 0.0  ;;  %v1000_v44 = vmax.f32 %v892_v49, 0.0  ;;  %v1053_v32 = vpack.c.bf16 %v997_v43, %v985_v45  ;;  %v1055_v0 = vpack.c.bf16 %v999_v63, %v987_v39 }
 0x14b   : > { %v1019_v7 = vpack.c.bf16 %v927_v4, %v915_v24 }
 0x14c   : > { %v1054_v41 = vpack.c.bf16 %v998_v37, %v986_v12  ;;  %v1056_v50 = vpack.c.bf16 %v1000_v44, %v988_v46 }
 0x14e   : > { %1390 = vmatprep.subr.bf16.mxu0 %v1054_v41  ;;  %1463 = vmatprep.subr.bf16.mxu1 %v1056_v50  ;;  %v940_v50 = vmax.f32 %v3352_v61, 0.0  ;;  %v937_v61 = vmax.f32 %v3346_v31, 0.0  ;;  %v913_v31 = vmax.f32 %v3322_v58, 0.0 }
 0x14f   : > { %2858 = vmatmul.mubr.msk.bf16.gmra.mxu0 %vm1077_vm2, %v3286_v47  ;;  %2862 = vmatmul.mubr.msk.bf16.gmra.mxu1 %vm1077_vm2, %v3286_v47 }
 0x150   : > { %1391 = vmatpush1.bf16.msra.mxu0 %v1053_v32  ;;  %1464 = vmatpush1.bf16.msra.mxu1 %v1055_v0  ;;  %v928_v0 = vmax.f32 %v3344_v5, 0.0  ;;  %v1030_v32 = vpack.c.bf16 %v950_v10, %v938_v13  ;;  %v1032_v27 = vpack.c.bf16 %v952_v19, %v940_v50  ;;  %v1029_v29 = vpack.c.bf16 %v949_v20, %v937_v61 }
 0x151   : > { %1392 = vmatprep.subr.bf16.mxu0 %v1042_v57  ;;  %1465 = vmatprep.subr.bf16.mxu1 %v1044_v11  ;;  %v1031_v5 = vpack.c.bf16 %v951_v42, %v939_v23  ;;  %v1017_v6 = vpack.c.bf16 %v925_v22, %v913_v31 }
 0x152   : > { %1414 = vmatprep.mubr.bf16.mxu0 %v3723_v51  ;;  %1487 = vmatprep.mubr.bf16.mxu1 %v3723_v51  ;;  %v1020_v56 = vpack.c.bf16 %v928_v0, %v916_v62 }
 0x154   : > { %1393 = vmatpush1.bf16.msra.mxu0 %v1041_v14  ;;  %1466 = vmatpush1.bf16.msra.mxu1 %v1043_v21 }
 0x155   : > { %1394 = vmatprep.subr.bf16.mxu0 %v1030_v32  ;;  %1467 = vmatprep.subr.bf16.mxu1 %v1032_v27 }
 0x158   : > { %1395 = vmatpush1.bf16.msra.mxu0 %v1029_v29  ;;  %1468 = vmatpush1.bf16.msra.mxu1 %v1031_v5 }
 0x159   : > { %1396 = vmatprep.subr.bf16.mxu0 %v1018_v55  ;;  %1469 = vmatprep.subr.bf16.mxu1 %v1020_v56 }
 0x15c   : > { %1397 = vmatpush1.bf16.msra.mxu0 %v1017_v6  ;;  %1470 = vmatpush1.bf16.msra.mxu1 %v1019_v7 }
 0x15f   : > { %2863 = vmatmul.mubr.msk.bf16.vlgmr.msra.gmra.mxu0 %vm1077_vm2, %v3229_v36  ;;  %2867 = vmatmul.mubr.msk.bf16.vlgmr.msra.gmra.mxu1 %vm1077_vm2, %v3229_v36  ;;  %v3426_v36 = vpop.f32.mrf.mxu0 }
 0x160   : > { %1424 = vmatprep.mubr.bf16.mxu0 %v3723_v51  ;;  %1497 = vmatprep.mubr.bf16.mxu1 %v3723_v51  ;;  %3724 = vst [vmem:[#allocation8_spill] sm:$0xff] %v3426_v36 }
 0x161   : > { %v3430_v58 = vpop.f32.mrf.mxu0 }
 0x163   : > { %v3434_v59 = vpop.f32.mrf.mxu0 }
 0x164   : > { %3726 = vst [vmem:[#allocation10_spill] sm:$0xff] %v3434_v59 }
 0x165   : > { %v3438_v3 = vpop.f32.mrf.mxu0 }
 0x166   : > { %3728 = vst [vmem:[#allocation12_spill] sm:$0xff] %v3438_v3 }
 0x167   : > { %2864 = vmatmul.mubr.msk.bf16.gmra.mxu0 %vm1077_vm2, %v3256_v17  ;;  %2868 = vmatmul.mubr.msk.bf16.gmra.mxu1 %vm1077_vm2, %v3256_v17  ;;  %v3428_v17 = vpop.f32.mrf.mxu1 }
 0x168   : > { %1434 = vmatprep.mubr.bf16.mxu0 %v3723_v51  ;;  %1507 = vmatprep.mubr.bf16.mxu1 %v3723_v51  ;;  %3725 = vst [vmem:[#allocation9_spill] sm:$0xff] %v3428_v17 }
 0x16f   : > { %2865 = vmatmul.mubr.msk.bf16.gmra.mxu0 %vm1077_vm2, %v3275_v28  ;;  %2869 = vmatmul.mubr.msk.bf16.gmra.mxu1 %vm1077_vm2, %v3275_v28  ;;  %v3432_v28 = vpop.f32.mrf.mxu1 }
 0x170   : > { %1444 = vmatprep.mubr.bf16.mxu0 %v3723_v51  ;;  %1517 = vmatprep.mubr.bf16.mxu1 %v3723_v51 }
 0x171   : > { %v3436_v2 = vpop.f32.mrf.mxu1 }
 0x172   : > { %3727 = vst [vmem:[#allocation11_spill] sm:$0xff] %v3436_v2 }
 0x173   : > { %v3440_v18 = vpop.f32.mrf.mxu1 }
 0x174   : > { %3729 = vst [vmem:[#allocation13_spill] sm:$0xff] %v3440_v18 }
 0x177   : > { %2866 = vmatmul.mubr.msk.bf16.gmra.mxu0 %vm1077_vm2, %v3286_v47  ;;  %2870 = vmatmul.mubr.msk.bf16.gmra.mxu1 %vm1077_vm2, %v3286_v47 }
 0x178   : > { %1714 = vmatprep.mubr.bf16.mxu0 %v3723_v51  ;;  %1757 = vmatprep.mubr.bf16.mxu1 %v3723_v51 }
 0x1ce   : > { %v3442_v47 = vpop.f32.mrf.mxu0  ;;  %v3444_v9 = vpop.f32.mrf.mxu1 }
 0x1d0   : > { %v3446_v12 = vpop.f32.mrf.mxu0  ;;  %v3448_v46 = vpop.f32.mrf.mxu1 }
 0x1d2   : > { %v3450_v60 = vpop.f32.mrf.mxu0  ;;  %v3452_v49 = vpop.f32.mrf.mxu1 }
 0x1d4   : > { %v3454_v43 = vpop.f32.mrf.mxu0  ;;  %v3456_v63 = vpop.f32.mrf.mxu1 }
 0x1d6   : > { %v3458_v37 = vpop.f32.mrf.mxu0  ;;  %v3460_v44 = vpop.f32.mrf.mxu1 }
 0x1d8   : > { %v3462_v8 = vpop.f32.mrf.mxu0  ;;  %v3464_v1 = vpop.f32.mrf.mxu1 }
 0x1d9   : > { %v1553_v36 = vmax.f32 %v3462_v8, 0.0 }
 0x1da   : > { %v3466_v45 = vpop.f32.mrf.mxu0  ;;  %v3468_v39 = vpop.f32.mrf.mxu1 }
 0x1db   : > { %v1564_v8 = vmax.f32 %v3466_v45, 0.0 }
 0x1dc   : > { %v1140_v41 = vpop.f32.mrf.mxu0  ;;  %v1213_v10 = vpop.f32.mrf.mxu1 }
 0x1de   : > { %v1144_v19 = vpop.f32.mrf.mxu0  ;;  %v1217_v57 = vpop.f32.mrf.mxu1 }
 0x1e0   : > { %v1146_v11 = vpop.f32.mrf.mxu0  ;;  %v1219_v35 = vpop.f32.mrf.mxu1 }
 0x1e1   : > { %v1577_v0 = vmax.f32 %v1146_v11, 0.0  ;;  %v1579_v32 = vmax.f32 %v1219_v35, 0.0 }
 0x1e2   : > { %v1148_v54 = vpop.f32.mrf.mxu0  ;;  %v1221_v13 = vpop.f32.mrf.mxu1 }
 0x1e4   : > { %v1150_v50 = vpop.f32.mrf.mxu0  ;;  %v1223_v20 = vpop.f32.mrf.mxu1 }
 0x1e5   : > { %v1589_v27 = vmax.f32 %v1150_v50, 0.0  ;;  %v1591_v61 = vmax.f32 %v1223_v20, 0.0  ;;  %v1576_v50 = vmax.f32 %v1144_v19, 0.0  ;;  %v1578_v20 = vmax.f32 %v1217_v57, 0.0 }
 0x1e6   : > { %v1154_v42 = vpop.f32.mrf.mxu0  ;;  %v1227_v14 = vpop.f32.mrf.mxu1  ;;  %v1554_v19 = vmax.f32 %v3460_v44, 0.0  ;;  %v1541_v57 = vmax.f32 %v3454_v43, 0.0  ;;  %v1540_v44 = vmax.f32 %v3450_v60, 0.0  ;;  %v1542_v43 = vmax.f32 %v3452_v49, 0.0 }
 0x1e7   : > { %v1600_v23 = vmax.f32 %v1154_v42, 0.0  ;;  %v1602_v48 = vmax.f32 %v1227_v14, 0.0  ;;  %v1651_v3 = vpack.c.bf16 %v1589_v27, %v1577_v0  ;;  %v1653_v17 = vpack.c.bf16 %v1591_v61, %v1579_v32 }
 0x1e8   : > { %v1156_v21 = vpop.f32.mrf.mxu0  ;;  %v1229_v30 = vpop.f32.mrf.mxu1  ;;  %v1588_v42 = vmax.f32 %v1148_v54, 0.0  ;;  %v1590_v14 = vmax.f32 %v1221_v13, 0.0  ;;  %v1531_v0 = vmax.f32 %v3448_v46, 0.0  ;;  %v1552_v32 = vmax.f32 %v3458_v37, 0.0 }
 0x1e9   : > { %v1601_v4 = vmax.f32 %v1156_v21, 0.0  ;;  %v1603_v29 = vmax.f32 %v1229_v30, 0.0  ;;  %v1555_v21 = vmax.f32 %v3464_v1, 0.0  ;;  %v1565_v30 = vmax.f32 %v1140_v41, 0.0 }
 0x1ea   : > { %v1158_v62 = vpop.f32.mrf.mxu0  ;;  %v1231_v22 = vpop.f32.mrf.mxu1  ;;  %v1566_v1 = vmax.f32 %v3468_v39, 0.0  ;;  %v1650_v41 = vpack.c.bf16 %v1588_v42, %v1576_v50  ;;  %v1528_v46 = vmax.f32 %v3442_v47, 0.0  ;;  %v1530_v37 = vmax.f32 %v3444_v9, 0.0 }
 0x1eb   : > { %v1612_v5 = vmax.f32 %v1158_v62, 0.0  ;;  %v1614_v55 = vmax.f32 %v1231_v22, 0.0  ;;  %v1567_v62 = vmax.f32 %v1213_v10, 0.0  ;;  %v1652_v10 = vpack.c.bf16 %v1590_v14, %v1578_v20  ;;  %v3503_v22 = vld [vmem:[%s3710_s3] sm:$0xff]  }
 0x1ec   : > { %v1160_v56 = vpop.f32.mrf.mxu0  ;;  %v1233_v31 = vpop.f32.mrf.mxu1  ;;  %v1639_v54 = vpack.c.bf16 %v1565_v30, %v1553_v36  ;;  %v1638_v45 = vpack.c.bf16 %v1564_v8, %v1552_v32  ;;  %v1626_v61 = vpack.c.bf16 %v1540_v44, %v1528_v46  ;;  %v1628_v60 = vpack.c.bf16 %v1542_v43, %v1530_v37 }
 0x1ed   : > { %v1613_v24 = vmax.f32 %v1160_v56, 0.0  ;;  %v1615_v6 = vmax.f32 %v1233_v31, 0.0  ;;  %v1662_v7 = vpack.c.bf16 %v1612_v5, %v1600_v23  ;;  %v1664_v18 = vpack.c.bf16 %v1614_v55, %v1602_v48 }
 0x1ee   : > { %v1529_v23 = vmax.f32 %v3446_v12, 0.0  ;;  %v1641_v12 = vpack.c.bf16 %v1567_v62, %v1555_v21 }
 0x1ef   : > { %v1663_v11 = vpack.c.bf16 %v1613_v24, %v1601_v4  ;;  %v1665_v35 = vpack.c.bf16 %v1615_v6, %v1603_v29 }
 0x1f0   : > { %v1627_v36 = vpack.c.bf16 %v1541_v57, %v1529_v23 }
 0x1f1   : > { %1690 = vmatprep.subr.bf16.mxu0 %v1663_v11  ;;  %1733 = vmatprep.subr.bf16.mxu1 %v1665_v35 }
 0x1f2   : > { %1691 = vmatpush1.bf16.msra.mxu0 %v1662_v7  ;;  %1734 = vmatpush1.bf16.msra.mxu1 %v1664_v18  ;;  %v1543_v18 = vmax.f32 %v3456_v63, 0.0  ;;  %v1640_v63 = vpack.c.bf16 %v1566_v1, %v1554_v19 }
 0x1f3   : > { %1692 = vmatprep.subr.bf16.mxu0 %v1651_v3  ;;  %1735 = vmatprep.subr.bf16.mxu1 %v1653_v17 }
 0x1f4   : > { %v1629_v39 = vpack.c.bf16 %v1543_v18, %v1531_v0 }
 0x1f6   : > { %1693 = vmatpush1.bf16.msra.mxu0 %v1650_v41  ;;  %1736 = vmatpush1.bf16.msra.mxu1 %v1652_v10 }
 0x1f7   : > { %v3482_v3 = vpop.f32.mrf.mxu0  ;;  %v3484_v17 = vpop.f32.mrf.mxu1  ;;  %1694 = vmatprep.subr.bf16.mxu0 %v1639_v54  ;;  %1737 = vmatprep.subr.bf16.mxu1 %v1641_v12 }
 0x1f9   : > { %v3488_v13 = vpop.f32.mrf.mxu0  ;;  %v3490_v27 = vpop.f32.mrf.mxu1 }
 0x1fa   : > { %1695 = vmatpush1.bf16.msra.mxu0 %v1638_v45  ;;  %1738 = vmatpush1.bf16.msra.mxu1 %v1640_v63 }
 0x1fb   : > { %v3492_v47 = vpop.f32.mrf.mxu0  ;;  %v3494_v9 = vpop.f32.mrf.mxu1  ;;  %1696 = vmatprep.subr.bf16.mxu0 %v1627_v36  ;;  %1739 = vmatprep.subr.bf16.mxu1 %v1629_v39 }
 0x1fd   : > { %v3496_v48 = vpop.f32.mrf.mxu0  ;;  %v3498_v49 = vpop.f32.mrf.mxu1 }
 0x1fe   : > { %1697 = vmatpush1.bf16.msra.mxu0 %v1626_v61  ;;  %1740 = vmatpush1.bf16.msra.mxu1 %v1628_v60 }
 0x1ff   : > { %v3505_v4 = vpop.f32.mrf.mxu0  ;;  %v3507_v29 = vpop.f32.mrf.mxu1 }
 0x201   : > { %v3509_v5 = vpop.f32.mrf.mxu0  ;;  %v3511_v55 = vpop.f32.mrf.mxu1  ;;  %2872 = vmatmul.mubr.msk.bf16.vlgmr.msra.gmra.mxu0 %vm1077_vm2, %v3503_v22  ;;  %2873 = vmatmul.mubr.msk.bf16.vlgmr.msra.gmra.mxu1 %vm1077_vm2, %v3503_v22 }
 0x202   : > { %1800 = vmatprep.mubr.bf16.mxu0 %v3723_v51  ;;  %1843 = vmatprep.mubr.bf16.mxu1 %v3723_v51  ;;  %v1557_v61 = vmax.f32 %v3509_v5, 0.0  ;;  %v1559_v60 = vmax.f32 %v3511_v55, 0.0  ;;  %v1535_v5 = vmax.f32 %v3490_v27, 0.0  ;;  %v1556_v55 = vmax.f32 %v3505_v4, 0.0 }
 0x203   : > { %v3519_v56 = vpop.f32.mrf.mxu0  ;;  %v3521_v31 = vpop.f32.mrf.mxu1  ;;  %v1544_v4 = vmax.f32 %v3492_v47, 0.0 }
 0x205   : > { %v1286_v24 = vpop.f32.mrf.mxu0  ;;  %v1359_v6 = vpop.f32.mrf.mxu1 }
 0x207   : > { %v1290_v7 = vpop.f32.mrf.mxu0  ;;  %v1363_v11 = vpop.f32.mrf.mxu1 }
 0x209   : > { %v1292_v35 = vpop.f32.mrf.mxu0  ;;  %v1365_v50 = vpop.f32.mrf.mxu1 }
 0x20a   : > { %v1581_v54 = vmax.f32 %v1292_v35, 0.0  ;;  %v1583_v12 = vmax.f32 %v1365_v50, 0.0  ;;  %v1569_v35 = vmax.f32 %v1286_v24, 0.0  ;;  %v1571_v50 = vmax.f32 %v1359_v6, 0.0 }
 0x20b   : > { %v1294_v20 = vpop.f32.mrf.mxu0  ;;  %v1367_v42 = vpop.f32.mrf.mxu1  ;;  %v1570_v24 = vmax.f32 %v3521_v31, 0.0 }
 0x20d   : > { %v1296_v14 = vpop.f32.mrf.mxu0  ;;  %v1369_v21 = vpop.f32.mrf.mxu1 }
 0x20e   : > { %v1593_v44 = vmax.f32 %v1296_v14, 0.0  ;;  %v1595_v43 = vmax.f32 %v1369_v21, 0.0  ;;  %v1533_v14 = vmax.f32 %v3488_v13, 0.0  ;;  %v1558_v21 = vmax.f32 %v3507_v29, 0.0 }
 0x20f   : > { %v1300_v30 = vpop.f32.mrf.mxu0  ;;  %v1373_v62 = vpop.f32.mrf.mxu1  ;;  %v1645_v13 = vpack.c.bf16 %v1571_v50, %v1559_v60 }
 0x210   : > { %v1604_v32 = vmax.f32 %v1300_v30, 0.0  ;;  %v1606_v19 = vmax.f32 %v1373_v62, 0.0  ;;  %v1655_v2 = vpack.c.bf16 %v1593_v44, %v1581_v54  ;;  %v1657_v59 = vpack.c.bf16 %v1595_v43, %v1583_v12 }
 0x211   : > { %v1302_v23 = vpop.f32.mrf.mxu0  ;;  %v1375_v0 = vpop.f32.mrf.mxu1 }
 0x212   : > { %v1605_v41 = vmax.f32 %v1302_v23, 0.0  ;;  %v1607_v10 = vmax.f32 %v1375_v0, 0.0  ;;  %v1580_v23 = vmax.f32 %v1290_v7, 0.0  ;;  %v1582_v0 = vmax.f32 %v1363_v11, 0.0 }
 0x213   : > { %v1304_v8 = vpop.f32.mrf.mxu0  ;;  %v1377_v1 = vpop.f32.mrf.mxu1  ;;  %v1568_v7 = vmax.f32 %v3519_v56, 0.0 }
 0x214   : > { %v1616_v57 = vmax.f32 %v1304_v8, 0.0  ;;  %v1618_v18 = vmax.f32 %v1377_v1, 0.0  ;;  %v1592_v8 = vmax.f32 %v1294_v20, 0.0  ;;  %v1594_v1 = vmax.f32 %v1367_v42, 0.0 }
 0x215   : > { %v1306_v46 = vpop.f32.mrf.mxu0  ;;  %v1379_v37 = vpop.f32.mrf.mxu1  ;;  %v1545_v20 = vmax.f32 %v3496_v48, 0.0  ;;  %v1547_v42 = vmax.f32 %v3498_v49, 0.0  ;;  %v1546_v48 = vmax.f32 %v3494_v9, 0.0  ;;  %v1642_v29 = vpack.c.bf16 %v1568_v7, %v1556_v55 }
 0x216   : > { %v1617_v45 = vmax.f32 %v1306_v46, 0.0  ;;  %v1619_v63 = vmax.f32 %v1379_v37, 0.0  ;;  %v1666_v36 = vpack.c.bf16 %v1616_v57, %v1604_v32  ;;  %v1668_v39 = vpack.c.bf16 %v1618_v18, %v1606_v19 }
 0x217   : > { %v1654_v6 = vpack.c.bf16 %v1592_v8, %v1580_v23  ;;  %v1656_v11 = vpack.c.bf16 %v1594_v1, %v1582_v0  ;;  %v1643_v32 = vpack.c.bf16 %v1569_v35, %v1557_v61  ;;  %v1644_v49 = vpack.c.bf16 %v1570_v24, %v1558_v21 }
 0x218   : > { %v1667_v30 = vpack.c.bf16 %v1617_v45, %v1605_v41  ;;  %v1669_v62 = vpack.c.bf16 %v1619_v63, %v1607_v10  ;;  %v1631_v41 = vpack.c.bf16 %v1545_v20, %v1533_v14  ;;  %v1633_v10 = vpack.c.bf16 %v1547_v42, %v1535_v5 }
 0x21a   : > { %1776 = vmatprep.subr.bf16.mxu0 %v1667_v30  ;;  %1819 = vmatprep.subr.bf16.mxu1 %v1669_v62 }
 0x21b   : > { %1777 = vmatpush1.bf16.msra.mxu0 %v1666_v36  ;;  %1820 = vmatpush1.bf16.msra.mxu1 %v1668_v39 }
 0x21c   : > { %1778 = vmatprep.subr.bf16.mxu0 %v1655_v2  ;;  %1821 = vmatprep.subr.bf16.mxu1 %v1657_v59  ;;  %v1532_v59 = vmax.f32 %v3482_v3, 0.0  ;;  %v1534_v2 = vmax.f32 %v3484_v17, 0.0 }
 0x21e   : > { %v1630_v3 = vpack.c.bf16 %v1544_v4, %v1532_v59  ;;  %v1632_v17 = vpack.c.bf16 %v1546_v48, %v1534_v2 }
 0x21f   : > { %v3533_v19 = vpop.f32.mrf.mxu0  ;;  %v3535_v27 = vpop.f32.mrf.mxu1  ;;  %1779 = vmatpush1.bf16.msra.mxu0 %v1654_v6  ;;  %1822 = vmatpush1.bf16.msra.mxu1 %v1656_v11 }
 0x220   : > { %1780 = vmatprep.subr.bf16.mxu0 %v1643_v32  ;;  %1823 = vmatprep.subr.bf16.mxu1 %v1645_v13 }
 0x221   : > { %v3541_v56 = vpop.f32.mrf.mxu0  ;;  %v3543_v31 = vpop.f32.mrf.mxu1 }
 0x223   : > { %v3545_v57 = vpop.f32.mrf.mxu0  ;;  %v3547_v18 = vpop.f32.mrf.mxu1  ;;  %1781 = vmatpush1.bf16.msra.mxu0 %v1642_v29  ;;  %1824 = vmatpush1.bf16.msra.mxu1 %v1644_v49 }
 0x224   : > { %1782 = vmatprep.subr.bf16.mxu0 %v1631_v41  ;;  %1825 = vmatprep.subr.bf16.mxu1 %v1633_v10 }
 0x225   : > { %v3549_v47 = vpop.f32.mrf.mxu0  ;;  %v3551_v9 = vpop.f32.mrf.mxu1 }
 0x227   : > { %v3553_v54 = vpop.f32.mrf.mxu0  ;;  %v3555_v12 = vpop.f32.mrf.mxu1  ;;  %1783 = vmatpush1.bf16.msra.mxu0 %v1630_v3  ;;  %1826 = vmatpush1.bf16.msra.mxu1 %v1632_v17 }
 0x229   : > { %v3557_v46 = vpop.f32.mrf.mxu0  ;;  %v3559_v37 = vpop.f32.mrf.mxu1 }
 0x22a   : > { %2874 = vmatmul.mubr.msk.bf16.vlgmr.msra.gmra.mxu0 %vm1077_vm2, %v3503_v22  ;;  %2875 = vmatmul.mubr.msk.bf16.vlgmr.msra.gmra.mxu1 %vm1077_vm2, %v3503_v22 }
 0x22b   : > { %v3565_v44 = vpop.f32.mrf.mxu0  ;;  %v3567_v43 = vpop.f32.mrf.mxu1  ;;  %1886 = vmatprep.mubr.bf16.mxu0 %v3723_v51  ;;  %1929 = vmatprep.mubr.bf16.mxu1 %v3723_v51 }
 0x22d   : > { %v1432_v45 = vpop.f32.mrf.mxu0  ;;  %v1505_v63 = vpop.f32.mrf.mxu1 }
 0x22f   : > { %v1436_v36 = vpop.f32.mrf.mxu0  ;;  %v1509_v39 = vpop.f32.mrf.mxu1 }
 0x231   : > { %v1438_v61 = vpop.f32.mrf.mxu0  ;;  %v1511_v60 = vpop.f32.mrf.mxu1 }
 0x232   : > { %v1585_v4 = vmax.f32 %v1438_v61, 0.0  ;;  %v1587_v48 = vmax.f32 %v1511_v60, 0.0  ;;  %v1563_v61 = vmax.f32 %v3559_v37, 0.0  ;;  %v1572_v60 = vmax.f32 %v3565_v44, 0.0 }
 0x233   : > { %v1440_v30 = vpop.f32.mrf.mxu0  ;;  %v1513_v62 = vpop.f32.mrf.mxu1  ;;  %v1537_v37 = vmax.f32 %v3541_v56, 0.0  ;;  %v1539_v44 = vmax.f32 %v3543_v31, 0.0 }
 0x234   : > { %v1596_v41 = vmax.f32 %v1440_v30, 0.0  ;;  %v1598_v10 = vmax.f32 %v1513_v62, 0.0  ;;  %v1574_v30 = vmax.f32 %v3567_v43, 0.0  ;;  %v1549_v62 = vmax.f32 %v3549_v47, 0.0 }
 0x235   : > { %v1442_v23 = vpop.f32.mrf.mxu0  ;;  %v1515_v0 = vpop.f32.mrf.mxu1  ;;  %v1548_v43 = vmax.f32 %v3545_v57, 0.0  ;;  %v1550_v47 = vmax.f32 %v3547_v18, 0.0 }
 0x236   : > { %v1597_v55 = vmax.f32 %v1442_v23, 0.0  ;;  %v1599_v21 = vmax.f32 %v1515_v0, 0.0  ;;  %v1573_v23 = vmax.f32 %v1432_v45, 0.0  ;;  %v1575_v0 = vmax.f32 %v1505_v63, 0.0 }
 0x237   : > { %v1446_v8 = vpop.f32.mrf.mxu0  ;;  %v1519_v1 = vpop.f32.mrf.mxu1 }
 0x238   : > { %v1608_v59 = vmax.f32 %v1446_v8, 0.0  ;;  %v1610_v2 = vmax.f32 %v1519_v1, 0.0  ;;  %v1561_v8 = vmax.f32 %v3557_v46, 0.0  ;;  %v1551_v1 = vmax.f32 %v3551_v9, 0.0 }
 0x239   : > { %v1448_v35 = vpop.f32.mrf.mxu0  ;;  %v1521_v50 = vpop.f32.mrf.mxu1  ;;  %v1562_v46 = vmax.f32 %v3555_v12, 0.0  ;;  %v1538_v12 = vmax.f32 %v3535_v27, 0.0 }
 0x23a   : > { %v1609_v20 = vmax.f32 %v1448_v35, 0.0  ;;  %v1611_v42 = vmax.f32 %v1521_v50, 0.0  ;;  %v1584_v35 = vmax.f32 %v1436_v36, 0.0  ;;  %v1586_v50 = vmax.f32 %v1509_v39, 0.0 }
 0x23b   : > { %v1450_v14 = vpop.f32.mrf.mxu0  ;;  %v1523_v5 = vpop.f32.mrf.mxu1  ;;  %v1647_v36 = vpack.c.bf16 %v1573_v23, %v1561_v8  ;;  %v1649_v39 = vpack.c.bf16 %v1575_v0, %v1563_v61  ;;  %v1648_v9 = vpack.c.bf16 %v1574_v30, %v1562_v46  ;;  %v1636_v31 = vpack.c.bf16 %v1550_v47, %v1538_v12 }
 0x23c   : > { %v1620_v7 = vmax.f32 %v1450_v14, 0.0  ;;  %v1622_v24 = vmax.f32 %v1523_v5, 0.0  ;;  %v1659_v14 = vpack.c.bf16 %v1597_v55, %v1585_v4  ;;  %v1661_v5 = vpack.c.bf16 %v1599_v21, %v1587_v48 }
 0x23d   : > { %v1452_v6 = vpop.f32.mrf.mxu0  ;;  %v1525_v11 = vpop.f32.mrf.mxu1  ;;  %v1658_v45 = vpack.c.bf16 %v1596_v41, %v1584_v35  ;;  %v1660_v63 = vpack.c.bf16 %v1598_v10, %v1586_v50  ;;  %v1560_v55 = vmax.f32 %v3553_v54, 0.0  ;;  %v1536_v54 = vmax.f32 %v3533_v19, 0.0 }
 0x23e   : > { %v1621_v32 = vmax.f32 %v1452_v6, 0.0  ;;  %v1623_v13 = vmax.f32 %v1525_v11, 0.0  ;;  %v1670_v3 = vpack.c.bf16 %v1620_v7, %v1608_v59  ;;  %v1672_v17 = vpack.c.bf16 %v1622_v24, %v1610_v2 }
 0x23f   : > { %v1646_v21 = vpack.c.bf16 %v1572_v60, %v1560_v55  ;;  %v1635_v7 = vpack.c.bf16 %v1549_v62, %v1537_v37  ;;  %v1637_v24 = vpack.c.bf16 %v1551_v1, %v1539_v44  ;;  %v1634_v56 = vpack.c.bf16 %v1548_v43, %v1536_v54 }
 0x240   : > { %v1671_v29 = vpack.c.bf16 %v1621_v32, %v1609_v20  ;;  %v1673_v49 = vpack.c.bf16 %v1623_v13, %v1611_v42  ;;  %v2991_v23 = vmov 1966171168  }
 0x241   : > { %v1981_v0 = vunpack.c.l.s4 %v2991_v23 }
 0x242   : > { %1862 = vmatprep.subr.bf16.mxu0 %v1671_v29  ;;  %1905 = vmatprep.subr.bf16.mxu1 %v1673_v49 }
 0x243   : > { %1863 = vmatpush1.bf16.msra.mxu0 %v1670_v3  ;;  %1906 = vmatpush1.bf16.msra.mxu1 %v1672_v17  ;;  %v3594_v17 = vld [vmem:[%s3711_s4] sm:$0xff]  }
 0x244   : > { %1864 = vmatprep.subr.bf16.mxu0 %v1659_v14  ;;  %1907 = vmatprep.subr.bf16.mxu1 %v1661_v5  ;;  %v1983_v14 = vlaneseq  ;;  %v1982_v5 = vunpack.c.0.s8 %v1981_v0 }
 0x246   : > { %v1984_v35 = vshrl.u32 %v1983_v14, 7  ;;  %vm2054_vm4 = vcmp.lt.s32.totalorder %v1983_v14, 512  ;;  %v2376_v14 = vld [vmem:[%s3713_s6] sm:$0x7] }
 0x247   : > { %1865 = vmatpush1.bf16.msra.mxu0 %v1658_v45  ;;  %1908 = vmatpush1.bf16.msra.mxu1 %v1660_v63 }
 0x248   : > { %1866 = vmatprep.subr.bf16.mxu0 %v1647_v36  ;;  %1909 = vmatprep.subr.bf16.mxu1 %v1649_v39  ;;  %v3603_v8 = vsub.s32 %v1982_v5, %v1984_v35 }
 0x249   : > { %2379 = vperm.xlu0 %2916, %v2376_v14  }
 0x24b   : > { %1867 = vmatpush1.bf16.msra.mxu0 %v1646_v21  ;;  %1910 = vmatpush1.bf16.msra.mxu1 %v1648_v9 }
 0x24c   : > { %1868 = vmatprep.subr.bf16.mxu0 %v1635_v7  ;;  %1911 = vmatprep.subr.bf16.mxu1 %v1637_v24 }
 0x24f   : > { %1869 = vmatpush1.bf16.msra.mxu0 %v1634_v56  ;;  %1912 = vmatpush1.bf16.msra.mxu1 %v1636_v31 }
 0x252   : > { %2876 = vmatmul.mubr.msk.bf16.vlgmr.msra.gmra.mxu0 %vm1077_vm2, %v3503_v22  ;;  %2877 = vmatmul.mubr.msk.bf16.vlgmr.msra.gmra.mxu1 %vm1077_vm2, %v3503_v22 }
 0x253   : > { %2113 = vmatprep.mubr.bf16.mxu0 %v3723_v51  ;;  %2156 = vmatprep.mubr.bf16.mxu1 %v3723_v51 }
 0x2c1   : > { %v1716_v19 = vpop.f32.mrf.mxu0  ;;  %v1759_v27 = vpop.f32.mrf.mxu1 }
 0x2c2   : > { %v1940_v20 = vmax.f32 %v1716_v19, 0.0  ;;  %v1942_v42 = vmax.f32 %v1759_v27, 0.0 }
 0x2c3   : > { %v1718_v57 = vpop.f32.mrf.mxu0  ;;  %v1761_v18 = vpop.f32.mrf.mxu1 }
 0x2c4   : > { %v1941_v59 = vmax.f32 %v1718_v57, 0.0  ;;  %v1943_v2 = vmax.f32 %v1761_v18, 0.0 }
 0x2c5   : > { %v1720_v6 = vpop.f32.mrf.mxu0  ;;  %v1763_v11 = vpop.f32.mrf.mxu1 }
 0x2c6   : > { %v1952_v32 = vmax.f32 %v1720_v6, 0.0  ;;  %v1954_v13 = vmax.f32 %v1763_v11, 0.0  ;;  %v1976_v50 = vcombine.low %v1940_v20, %v1941_v59  ;;  %v1977_v61 = vcombine.low %v1942_v42, %v1943_v2 }
 0x2c7   : > { %v1722_v4 = vpop.f32.mrf.mxu0  ;;  %v1765_v48 = vpop.f32.mrf.mxu1 }
 0x2c8   : > { %v1953_v29 = vmax.f32 %v1722_v4, 0.0  ;;  %v1955_v22 = vmax.f32 %v1765_v48, 0.0  ;;  %v2060_v49 = vpack.c.bf16 %v1952_v32, %v1940_v20  ;;  %v2062_v41 = vpack.c.bf16 %v1954_v13, %v1942_v42 }
 0x2c9   : > { %v1986_v60 = vrot.slane %v1976_v50, %v3603_v8  ;;  %v1993_v30 = vrot.slane %v1977_v61, %v3603_v8 }
 0x2ca   : > { %v2061_v10 = vpack.c.bf16 %v1953_v29, %v1941_v59  ;;  %v2063_v3 = vpack.c.bf16 %v1955_v22, %v1943_v2 }
 0x2cb   : > { %v2008_v37 = vcombine.low %v1986_v60, %v1993_v30 }
 0x2cc   : > { %2095 = vmatprep.subr.bf16.mxu0 %v2061_v10  ;;  %2138 = vmatprep.subr.bf16.mxu1 %v2063_v3 }
 0x2cd   : > { %2096 = vmatpush1.bf16.msra.mxu0 %v2060_v49  ;;  %2139 = vmatpush1.bf16.msra.mxu1 %v2062_v41  ;;  %v2016_v27 = vrot.slane %v2008_v37, %v3603_v8 }
 0x2d0   : > { %2880 = vmatmul.mubr.msk.bf16.vlgmr.msra.gmra.mxu0 %vm2077_vm3, %v3594_v17  ;;  %2881 = vmatmul.mubr.msk.bf16.vlgmr.msra.gmra.mxu1 %vm2077_vm3, %v3594_v17 }
 0x2d1   : > { %2199 = vmatprep.mubr.bf16.mxu0 %v3723_v51  ;;  %2242 = vmatprep.mubr.bf16.mxu1 %v3723_v51 }
 0x2ea   : > { %v1802_v45 = vpop.f32.mrf.mxu0  ;;  %v1845_v63 = vpop.f32.mrf.mxu1 }
 0x2eb   : > { %v1944_v36 = vmax.f32 %v1802_v45, 0.0  ;;  %v1946_v39 = vmax.f32 %v1845_v63, 0.0 }
 0x2ec   : > { %v1804_v62 = vpop.f32.mrf.mxu0  ;;  %v1847_v1 = vpop.f32.mrf.mxu1 }
 0x2ed   : > { %v1945_v55 = vmax.f32 %v1804_v62, 0.0  ;;  %v1947_v46 = vmax.f32 %v1847_v1, 0.0 }
 0x2ee   : > { %v1806_v44 = vpop.f32.mrf.mxu0  ;;  %v1849_v43 = vpop.f32.mrf.mxu1 }
 0x2ef   : > { %v1978_v47 = vcombine.low %v1944_v36, %v1945_v55  ;;  %v1979_v21 = vcombine.low %v1946_v39, %v1947_v46  ;;  %v1956_v9 = vmax.f32 %v1806_v44, 0.0  ;;  %v1958_v7 = vmax.f32 %v1849_v43, 0.0 }
 0x2f0   : > { %v1808_v24 = vpop.f32.mrf.mxu0  ;;  %v1851_v54 = vpop.f32.mrf.mxu1 }
 0x2f1   : > { %v2000_v12 = vrot.slane %v1978_v47, %v3603_v8  ;;  %v2007_v56 = vrot.slane %v1979_v21, %v3603_v8  ;;  %v1957_v31 = vmax.f32 %v1808_v24, 0.0  ;;  %v1959_v19 = vmax.f32 %v1851_v54, 0.0 }
 0x2f2   : > { %v2064_v18 = vpack.c.bf16 %v1956_v9, %v1944_v36  ;;  %v2066_v6 = vpack.c.bf16 %v1958_v7, %v1946_v39 }
 0x2f3   : > { %v2009_v57 = vcombine.low %v2000_v12, %v2007_v56  ;;  %v2065_v11 = vpack.c.bf16 %v1957_v31, %v1945_v55  ;;  %v2067_v20 = vpack.c.bf16 %v1959_v19, %v1947_v46 }
 0x2f5   : > { %v2023_v42 = vrot.slane %v2009_v57, %v3603_v8  ;;  %2181 = vmatprep.subr.bf16.mxu0 %v2065_v11  ;;  %2224 = vmatprep.subr.bf16.mxu1 %v2067_v20 }
 0x2f6   : > { %2182 = vmatpush1.bf16.msra.mxu0 %v2064_v18  ;;  %2225 = vmatpush1.bf16.msra.mxu1 %v2066_v6 }
 0x2f7   : > { %v2024_v32 = vcombine.low %v2016_v27, %v2023_v42 }
 0x2f9   : > { %2051 = vst [vmem:[%s3616_s12] ss:$4 sm:$0xff] %v2024_v32  ;;  %2882 = vmatmul.mubr.msk.bf16.vlgmr.msra.gmra.mxu0 %vm2077_vm3, %v3594_v17  ;;  %2883 = vmatmul.mubr.msk.bf16.vlgmr.msra.gmra.mxu1 %vm2077_vm3, %v3594_v17 }
 0x2fa   : > { %2285 = vmatprep.mubr.bf16.mxu0 %v3723_v51  ;;  %2328 = vmatprep.mubr.bf16.mxu1 %v3723_v51 }
 0x312   : > { %v1888_v13 = vpop.f32.mrf.mxu0  ;;  %v1931_v59 = vpop.f32.mrf.mxu1 }
 0x313   : > { %v1948_v48 = vmax.f32 %v1888_v13, 0.0  ;;  %v1950_v29 = vmax.f32 %v1931_v59, 0.0 }
 0x314   : > { %v1890_v2 = vpop.f32.mrf.mxu0  ;;  %v1933_v4 = vpop.f32.mrf.mxu1 }
 0x315   : > { %v1949_v22 = vmax.f32 %v1890_v2, 0.0  ;;  %v1951_v49 = vmax.f32 %v1933_v4, 0.0 }
 0x316   : > { %v1892_v41 = vpop.f32.mrf.mxu0  ;;  %v1935_v10 = vpop.f32.mrf.mxu1 }
 0x317   : > { %v2025_v3 = vcombine.low %v1948_v48, %v1949_v22  ;;  %v2026_v23 = vcombine.low %v1950_v29, %v1951_v49  ;;  %v1960_v61 = vmax.f32 %v1892_v41, 0.0  ;;  %v1962_v60 = vmax.f32 %v1935_v10, 0.0  ;;  %v3732_v10 = vld [vmem:[#allocation2_spill] sm:$0xff] }
 0x318   : > { %v1894_v0 = vpop.f32.mrf.mxu0  ;;  %v1937_v5 = vpop.f32.mrf.mxu1 }
 0x319   : > { %v2033_v35 = vrot.slane %v2025_v3, %v3603_v8  ;;  %v2040_v50 = vrot.slane %v2026_v23, %v3603_v8  ;;  %v1961_v30 = vmax.f32 %v1894_v0, 0.0  ;;  %v1963_v45 = vmax.f32 %v1937_v5, 0.0  ;;  %v3733_v23 = vld [vmem:[#allocation3_spill] sm:$0xff] }
 0x31a   : > { %v2068_v39 = vpack.c.bf16 %v1960_v61, %v1948_v48  ;;  %v2070_v55 = vpack.c.bf16 %v1962_v60, %v1950_v29  ;;  %v3730_v29 = vld [vmem:[#allocation4_spill] sm:$0xff]  ;;  %v3735_v60 = vld [vmem:[#allocation7_spill] sm:$0xff] }
 0x31b   : > { %v2041_v63 = vcombine.low %v2033_v35, %v2040_v50  ;;  %v2069_v62 = vpack.c.bf16 %v1961_v30, %v1949_v22  ;;  %v2071_v1 = vpack.c.bf16 %v1963_v45, %v1951_v49  ;;  %v3731_v49 = vld [vmem:[#allocation5_spill] sm:$0xff]  ;;  %v3734_v50 = vld [vmem:[#allocation6_spill] sm:$0xff] }
 0x31d   : > { %v2048_v36 = vrot.slane %v2041_v63, %v3603_v8  ;;  %2267 = vmatprep.subr.bf16.mxu0 %v2069_v62  ;;  %2310 = vmatprep.subr.bf16.mxu1 %v2071_v1 }
 0x31e   : > { %2268 = vmatpush1.bf16.msra.mxu0 %v2068_v39  ;;  %2311 = vmatpush1.bf16.msra.mxu1 %v2070_v55 }
 0x31f   : > { %2878 = vst.msk [vmem:[%s3616_s12 + $0x20] ss:$4 sm:$0xf] %vm2054_vm4, %v2048_v36 }
 0x321   : > { %2884 = vmatmul.mubr.msk.bf16.vlgmr.msra.gmra.mxu0 %vm2077_vm3, %v3594_v17  ;;  %2885 = vmatmul.mubr.msk.bf16.vlgmr.msra.gmra.mxu1 %vm2077_vm3, %v3594_v17 }
 0x322   : > { %2417 = vmatprep.mubr.bf16.mxu0 %v3723_v51  ;;  %2458 = vmatprep.mubr.bf16.mxu1 %v3723_v51 }
 0x390   : > { %v2115_v8 = vpop.f32.mrf.mxu0  ;;  %v2158_v46 = vpop.f32.mrf.mxu1 }
 0x391   : > { %v2116_v24 = vadd.f32 %v2115_v8, %v3178_v15  ;;  %v2159_v54 = vadd.f32 %v2158_v46, %v3180_v16  ;;  %v3650_v16 = vld [vmem:[%s3712_s5] sm:$0x3] }
 0x392   : > { %v2117_v37 = vpop.f32.mrf.mxu0  ;;  %v2160_v44 = vpop.f32.mrf.mxu1 }
 0x393   : > { %v2118_v21 = vadd.f32 %v2117_v37, %v3182_v25  ;;  %v2161_v9 = vadd.f32 %v2160_v44, %v3184_v26  ;;  %v2339_v11 = vmax.f32 %v2116_v24, 0.0  ;;  %v3736_v24 = vld [vmem:[#allocation10_spill] sm:$0xff] }
 0x394   : > { %v2119_v43 = vpop.f32.mrf.mxu0  ;;  %v2162_v47 = vpop.f32.mrf.mxu1 }
 0x395   : > { %v2120_v17 = vadd.f32 %v2119_v43, %v3188_v33  ;;  %v2163_v7 = vadd.f32 %v2162_v47, %v3190_v34  ;;  %v2340_v18 = vmax.f32 %v2118_v21, 0.0  ;;  %v2342_v25 = vmax.f32 %v2161_v9, 0.0 }
 0x396   : > { %v2121_v12 = vpop.f32.mrf.mxu0  ;;  %v2164_v56 = vpop.f32.mrf.mxu1  ;;  %v2341_v33 = vmax.f32 %v2159_v54, 0.0 }
 0x397   : > { %v2122_v31 = vadd.f32 %v2121_v12, %v3196_v52  ;;  %v2165_v19 = vadd.f32 %v2164_v56, %v3198_v53  ;;  %v2351_v27 = vmax.f32 %v2120_v17, 0.0  ;;  %v2353_v57 = vmax.f32 %v2163_v7, 0.0  ;;  %v3737_v12 = vld [vmem:[#allocation11_spill] sm:$0xff] }
 0x399   : > { %v2352_v6 = vmax.f32 %v2122_v31, 0.0  ;;  %v2354_v26 = vmax.f32 %v2165_v19, 0.0  ;;  %v2364_v42 = vpack.c.bf16 %v2351_v27, %v2339_v11  ;;  %v2366_v15 = vpack.c.bf16 %v2353_v57, %v2341_v33  ;;  %v3738_v31 = vld [vmem:[#allocation8_spill] sm:$0xff]  ;;  %v3739_v27 = vld [vmem:[#allocation9_spill] sm:$0xff] }
 0x39b   : > { %v2365_v20 = vpack.c.bf16 %v2352_v6, %v2340_v18  ;;  %v2367_v34 = vpack.c.bf16 %v2354_v26, %v2342_v25  ;;  %v3740_v25 = vld [vmem:[#allocation12_spill] sm:$0xff]  ;;  %v3741_v26 = vld [vmem:[#allocation13_spill] sm:$0xff] }
 0x39d   : > { %2399 = vmatprep.subr.bf16.mxu0 %v2365_v20  ;;  %2440 = vmatprep.subr.bf16.mxu1 %v2367_v34 }
 0x39e   : > { %2400 = vmatpush1.bf16.msra.mxu0 %v2364_v42  ;;  %2441 = vmatpush1.bf16.msra.mxu1 %v2366_v15 }
 0x3a1   : > { %2886 = vmatmul.mubr.msk.bf16.vlgmr.msra.gmra.mxu0 %vm2077_vm3, %v3650_v16  ;;  %2887 = vmatmul.mubr.msk.bf16.vlgmr.msra.gmra.mxu1 %vm2077_vm3, %v3650_v16 }
 0x3a2   : > { %2499 = vmatprep.mubr.bf16.mxu0 %v3723_v51  ;;  %2540 = vmatprep.mubr.bf16.mxu1 %v3723_v51 }
 0x3b9   : > { %v2201_v52 = vpop.f32.mrf.mxu0  ;;  %v2244_v53 = vpop.f32.mrf.mxu1 }
 0x3ba   : > { %v2202_v3 = vadd.f32 %v2201_v52, %v3732_v10  ;;  %v2245_v0 = vadd.f32 %v2244_v53, %v3733_v23 }
 0x3bb   : > { %v2203_v32 = vpop.f32.mrf.mxu0  ;;  %v2246_v13 = vpop.f32.mrf.mxu1 }
 0x3bc   : > { %v2204_v4 = vadd.f32 %v2203_v32, %v3292_v38  ;;  %v2247_v48 = vadd.f32 %v2246_v13, %v3294_v40  ;;  %v2343_v36 = vmax.f32 %v2202_v3, 0.0  ;;  %v2345_v39 = vmax.f32 %v2245_v0, 0.0 }
 0x3bd   : > { %v2205_v59 = vpop.f32.mrf.mxu0  ;;  %v2248_v2 = vpop.f32.mrf.mxu1 }
 0x3be   : > { %v2206_v22 = vadd.f32 %v2205_v59, %v3730_v29  ;;  %v2249_v41 = vadd.f32 %v2248_v2, %v3731_v49  ;;  %v2344_v62 = vmax.f32 %v2204_v4, 0.0  ;;  %v2346_v38 = vmax.f32 %v2247_v48, 0.0  ;;  %v3684_v2 = vpop.permute.xlu0 %2379 }
 0x3bf   : > { %v2207_v5 = vpop.f32.mrf.mxu0  ;;  %v2250_v35 = vpop.f32.mrf.mxu1 }
 0x3c0   : > { %v2208_v61 = vadd.f32 %v2207_v5, %v3734_v50  ;;  %v2251_v30 = vadd.f32 %v2250_v35, %v3735_v60  ;;  %v2355_v45 = vmax.f32 %v2206_v22, 0.0  ;;  %v2357_v63 = vmax.f32 %v2249_v41, 0.0 }
 0x3c2   : > { %v2356_v1 = vmax.f32 %v2208_v61, 0.0  ;;  %v2358_v40 = vmax.f32 %v2251_v30, 0.0  ;;  %v2368_v8 = vpack.c.bf16 %v2355_v45, %v2343_v36  ;;  %v2370_v46 = vpack.c.bf16 %v2357_v63, %v2345_v39 }
 0x3c4   : > { %v2369_v55 = vpack.c.bf16 %v2356_v1, %v2344_v62  ;;  %v2371_v14 = vpack.c.bf16 %v2358_v40, %v2346_v38 }
 0x3c6   : > { %2481 = vmatprep.subr.bf16.mxu0 %v2369_v55  ;;  %2522 = vmatprep.subr.bf16.mxu1 %v2371_v14 }
 0x3c7   : > { %2482 = vmatpush1.bf16.msra.mxu0 %v2368_v8  ;;  %2523 = vmatpush1.bf16.msra.mxu1 %v2370_v46 }
 0x3ca   : > { %2888 = vmatmul.mubr.msk.bf16.vlgmr.msra.gmra.mxu0 %vm2077_vm3, %v3650_v16  ;;  %2889 = vmatmul.mubr.msk.bf16.vlgmr.msra.gmra.mxu1 %vm2077_vm3, %v3650_v16 }
 0x3cb   : > { %2581 = vmatprep.mubr.bf16.mxu0 %v3723_v51  ;;  %2622 = vmatprep.mubr.bf16.mxu1 %v3723_v51 }
 0x3e1   : > { %v2287_v37 = vpop.f32.mrf.mxu0  ;;  %v2330_v44 = vpop.f32.mrf.mxu1 }
 0x3e2   : > { %v2288_v19 = vadd.f32 %v2287_v37, %v3738_v31  ;;  %v2331_v57 = vadd.f32 %v2330_v44, %v3739_v27 }
 0x3e3   : > { %v2289_v43 = vpop.f32.mrf.mxu0  ;;  %v2332_v47 = vpop.f32.mrf.mxu1 }
 0x3e4   : > { %v2290_v17 = vadd.f32 %v2289_v43, %v3430_v58  ;;  %v2333_v7 = vadd.f32 %v2332_v47, %v3432_v28  ;;  %v2347_v15 = vmax.f32 %v2288_v19, 0.0  ;;  %v2349_v52 = vmax.f32 %v2331_v57, 0.0 }
 0x3e5   : > { %v2291_v21 = vpop.f32.mrf.mxu0  ;;  %v2334_v9 = vpop.f32.mrf.mxu1 }
 0x3e6   : > { %v2292_v54 = vadd.f32 %v2291_v21, %v3736_v24  ;;  %v2335_v56 = vadd.f32 %v2334_v9, %v3737_v12  ;;  %v2348_v34 = vmax.f32 %v2290_v17, 0.0  ;;  %v2350_v58 = vmax.f32 %v2333_v7, 0.0 }
 0x3e7   : > { %v2293_v18 = vpop.f32.mrf.mxu0  ;;  %v2336_v51 = vpop.f32.mrf.mxu1 }
 0x3e8   : > { %v2294_v6 = vadd.f32 %v2293_v18, %v3740_v25  ;;  %v2337_v11 = vadd.f32 %v2336_v51, %v3741_v26  ;;  %v2359_v33 = vmax.f32 %v2292_v54, 0.0  ;;  %v2361_v20 = vmax.f32 %v2335_v56, 0.0 }
 0x3ea   : > { %v2360_v42 = vmax.f32 %v2294_v6, 0.0  ;;  %v2362_v28 = vmax.f32 %v2337_v11, 0.0  ;;  %v2372_v13 = vpack.c.bf16 %v2359_v33, %v2347_v15  ;;  %v2374_v59 = vpack.c.bf16 %v2361_v20, %v2349_v52 }
 0x3ec   : > { %v2373_v53 = vpack.c.bf16 %v2360_v42, %v2348_v34  ;;  %v2375_v32 = vpack.c.bf16 %v2362_v28, %v2350_v58 }
 0x3ee   : > { %2563 = vmatprep.subr.bf16.mxu0 %v2373_v53  ;;  %2604 = vmatprep.subr.bf16.mxu1 %v2375_v32 }
 0x3ef   : > { %2564 = vmatpush1.bf16.msra.mxu0 %v2372_v13  ;;  %2605 = vmatpush1.bf16.msra.mxu1 %v2374_v59 }
 0x3f2   : > { %2890 = vmatmul.mubr.msk.bf16.vlgmr.msra.gmra.mxu0 %vm2077_vm3, %v3650_v16  ;;  %2891 = vmatmul.mubr.msk.bf16.vlgmr.msra.gmra.mxu1 %vm2077_vm3, %v3650_v16 }
 0x461   : > { %v2419_v4 = vpop.f32.mrf.mxu0  ;;  %v2460_v48 = vpop.f32.mrf.mxu1 }
 0x462   : > { %v2420_v29 = vadd.f32 %v2419_v4, %v3684_v2  ;;  %v2461_v22 = vadd.f32 %v2460_v48, %v3684_v2 }
 0x463   : > { %v2421_v49 = vpop.f32.mrf.mxu0  ;;  %v2462_v41 = vpop.f32.mrf.mxu1 }
 0x464   : > { %v2422_v10 = vadd.f32 %v2421_v49, %v3684_v2  ;;  %v2463_v3 = vadd.f32 %v2462_v41, %v3684_v2  ;;  %v2892_v23 = vmul.f32 -1.442695, %v2420_v29  ;;  %v2894_v0 = vmul.f32 -1.442695, %v2461_v22 }
 0x465   : > { %v2423_v5 = vpop.f32.mrf.mxu0  ;;  %v2464_v35 = vpop.f32.mrf.mxu1 }
 0x466   : > { %2934 = vpow2.f32 %v2892_v23  ;;  %v2893_v16 = vmul.f32 -1.442695, %v2422_v10  ;;  %v2895_v50 = vmul.f32 -1.442695, %v2463_v3 }
 0x467   : > { %2936 = vpow2.f32 %v2894_v0  ;;  %v2424_v61 = vpop.f32.mrf.mxu0  ;;  %v2465_v60 = vpop.f32.mrf.mxu1 }
 0x468   : > { %2938 = vpow2.f32 %v2893_v16 }
 0x469   : > { %2940 = vpow2.f32 %v2895_v50 }
 0x473   : > { %v2935_v30 = vpop.eup %2934 }
 0x474   : > { %v2937_v45 = vpop.eup %2936  ;;  %v2667_v63 = vadd.f32 1.0, %v2935_v30 }
 0x475   : > { %v2939_v62 = vpop.eup %2938  ;;  %v2669_v38 = vadd.f32 1.0, %v2937_v45 }
 0x476   : > { %v2941_v1 = vpop.eup %2940  ;;  %v2668_v40 = vadd.f32 1.0, %v2939_v62  ;;  %2942 = vrcp.f32 %v2667_v63 }
 0x477   : > { %v2670_v36 = vadd.f32 1.0, %v2941_v1  ;;  %2944 = vrcp.f32 %v2669_v38 }
 0x478   : > { %2946 = vrcp.f32 %v2668_v40 }
 0x479   : > { %2948 = vrcp.f32 %v2670_v36 }
 0x483   : > { %v2943_v39 = vpop.eup %2942 }
 0x484   : > { %v2945_v55 = vpop.eup %2944 }
 0x485   : > { %v2947_v14 = vpop.eup %2946 }
 0x486   : > { %v2949_v8 = vpop.eup %2948  ;;  %v2715_v46 = vcombine.low %v2943_v39, %v2947_v14 }
 0x487   : > { %v2716_v37 = vcombine.low %v2945_v55, %v2949_v8 }
 0x488   : > { %v2721_v44 = vrot.slane %v2715_v46, 7 }
 0x489   : > { %v2722_v43 = vrot.slane %v2716_v37, 7 }
 0x48a   : > { %2733 = vst [vmem:[%s3616_s12] sm:$0xee] %v2721_v44  ;;  %v2501_v47 = vpop.f32.mrf.mxu0  ;;  %v2542_v21 = vpop.f32.mrf.mxu1 }
 0x48b   : > { %2734 = vst [vmem:[%s3616_s12 + $0x8] sm:$0xee] %v2722_v43  ;;  %v2502_v9 = vadd.f32 %v2501_v47, %v3684_v2  ;;  %v2543_v17 = vadd.f32 %v2542_v21, %v3684_v2 }
 0x48c   : > { %v2503_v7 = vpop.f32.mrf.mxu0  ;;  %v2544_v24 = vpop.f32.mrf.mxu1 }
 0x48d   : > { %v2896_v54 = vmul.f32 -1.442695, %v2502_v9  ;;  %v2898_v12 = vmul.f32 -1.442695, %v2543_v17  ;;  %v2504_v56 = vadd.f32 %v2503_v7, %v3684_v2  ;;  %v2545_v31 = vadd.f32 %v2544_v24, %v3684_v2 }
 0x48e   : > { %v2505_v19 = vpop.f32.mrf.mxu0  ;;  %v2546_v27 = vpop.f32.mrf.mxu1 }
 0x48f   : > { %2950 = vpow2.f32 %v2896_v54  ;;  %v2897_v57 = vmul.f32 -1.442695, %v2504_v56  ;;  %v2899_v18 = vmul.f32 -1.442695, %v2545_v31 }
 0x490   : > { %2952 = vpow2.f32 %v2898_v12  ;;  %v2506_v51 = vpop.f32.mrf.mxu0  ;;  %v2547_v25 = vpop.f32.mrf.mxu1 }
 0x491   : > { %2954 = vpow2.f32 %v2897_v57 }
 0x492   : > { %2956 = vpow2.f32 %v2899_v18 }
 0x49c   : > { %v2951_v6 = vpop.eup %2950 }
 0x49d   : > { %v2953_v26 = vpop.eup %2952  ;;  %v2671_v11 = vadd.f32 1.0, %v2951_v6 }
 0x49e   : > { %v2955_v33 = vpop.eup %2954  ;;  %v2673_v20 = vadd.f32 1.0, %v2953_v26 }
 0x49f   : > { %v2957_v34 = vpop.eup %2956  ;;  %2958 = vrcp.f32 %v2671_v11  ;;  %v2672_v58 = vadd.f32 1.0, %v2955_v33 }
 0x4a0   : > { %2960 = vrcp.f32 %v2673_v20  ;;  %v2674_v42 = vadd.f32 1.0, %v2957_v34 }
 0x4a1   : > { %2962 = vrcp.f32 %v2672_v58 }
 0x4a2   : > { %2964 = vrcp.f32 %v2674_v42 }
 0x4ac   : > { %v2959_v28 = vpop.eup %2958 }
 0x4ad   : > { %v2961_v15 = vpop.eup %2960 }
 0x4ae   : > { %v2963_v52 = vpop.eup %2962 }
 0x4af   : > { %v2965_v53 = vpop.eup %2964  ;;  %v2717_v32 = vcombine.low %v2959_v28, %v2963_v52 }
 0x4b0   : > { %v2718_v13 = vcombine.low %v2961_v15, %v2965_v53 }
 0x4b1   : > { %v2723_v59 = vrot.slane %v2717_v32, 7 }
 0x4b2   : > { %v2724_v4 = vrot.slane %v2718_v13, 7  ;;  %v2583_v48 = vpop.f32.mrf.mxu0  ;;  %v2624_v29 = vpop.f32.mrf.mxu1 }
 0x4b3   : > { %2735 = vst [vmem:[%s3616_s12 + $0x10] sm:$0xee] %v2723_v59  ;;  %v2584_v22 = vadd.f32 %v2583_v48, %v3684_v2  ;;  %v2625_v49 = vadd.f32 %v2624_v29, %v3684_v2 }
 0x4b4   : > { %2736 = vst [vmem:[%s3616_s12 + $0x18] sm:$0xee] %v2724_v4  ;;  %v2585_v41 = vpop.f32.mrf.mxu0  ;;  %v2626_v10 = vpop.f32.mrf.mxu1 }
 0x4b5   : > { %v2900_v3 = vmul.f32 -1.442695, %v2584_v22  ;;  %v2902_v23 = vmul.f32 -1.442695, %v2625_v49  ;;  %v2586_v0 = vadd.f32 %v2585_v41, %v3684_v2  ;;  %v2627_v5 = vadd.f32 %v2626_v10, %v3684_v2 }
 0x4b6   : > { %v2587_v35 = vpop.f32.mrf.mxu0  ;;  %v2628_v16 = vpop.f32.mrf.mxu1 }
 0x4b7   : > { %2966 = vpow2.f32 %v2900_v3  ;;  %v2901_v50 = vmul.f32 -1.442695, %v2586_v0  ;;  %v2903_v61 = vmul.f32 -1.442695, %v2627_v5 }
 0x4b8   : > { %2968 = vpow2.f32 %v2902_v23  ;;  %v2588_v60 = vpop.f32.mrf.mxu0  ;;  %v2629_v30 = vpop.f32.mrf.mxu1 }
 0x4b9   : > { %2970 = vpow2.f32 %v2901_v50 }
 0x4ba   : > { %2972 = vpow2.f32 %v2903_v61 }
 0x4c4   : > { %v2967_v45 = vpop.eup %2966 }
 0x4c5   : > { %v2969_v63 = vpop.eup %2968  ;;  %v2675_v62 = vadd.f32 1.0, %v2967_v45 }
 0x4c6   : > { %v2971_v38 = vpop.eup %2970  ;;  %v2677_v1 = vadd.f32 1.0, %v2969_v63 }
 0x4c7   : > { %v2973_v40 = vpop.eup %2972  ;;  %2974 = vrcp.f32 %v2675_v62  ;;  %v2676_v2 = vadd.f32 1.0, %v2971_v38 }
 0x4c8   : > { %2976 = vrcp.f32 %v2677_v1  ;;  %v2678_v36 = vadd.f32 1.0, %v2973_v40 }
 0x4c9   : > { %2978 = vrcp.f32 %v2676_v2 }
 0x4ca   : > { %2980 = vrcp.f32 %v2678_v36 }
 0x4d4   : > { %v2975_v39 = vpop.eup %2974 }
 0x4d5   : > { %v2977_v55 = vpop.eup %2976 }
 0x4d6   : > { %v2979_v14 = vpop.eup %2978 }
 0x4d7   : > { %v2981_v8 = vpop.eup %2980  ;;  %v2719_v46 = vcombine.low %v2975_v39, %v2979_v14 }
 0x4d8   : > { %v2720_v37 = vcombine.low %v2977_v55, %v2981_v8 }
 0x4d9   : > { %v2725_v44 = vrot.slane %v2719_v46, 7 }
 0x4da   : > { %v2726_v43 = vrot.slane %v2720_v37, 7 }
 0x4db   : > { %2737 = vst [vmem:[%s3616_s12 + $0x20] sm:$0xee] %v2725_v44 }
 0x4dc   : > { %2738 = vst [vmem:[%s3616_s12 + $0x28] sm:$0xee] %v2726_v43 }
 0x4dd PF: > { %s17_s24 = sadd.s32 1, %s2988_s24  }
 0x4de   : > { %p14_p4 = scmp.ge.s32.totalorder %s17_s24, 4  }
 0x4e0   :  { %16 = sbr.rel (!%p14_p4) target bundleno = 1 (0x1), region = 79 }

</bundles_post_ra>
